<compile_context>
chip_gen: v6e
topology: v6e:2x2x1
jax: 0.10.0
libtpu: 0.0.40
codegen_flags: <defaults>
</compile_context>

<pallas_src>
import jax
import jax.numpy as jnp
from jax.experimental import pallas as pl
from jax.experimental.pallas import tpu as pltpu


def _se_fusion_kernel(
    rgb_ref, depth_ref,
    w1r_ref, b1r_ref, w2r_ref, b2r_ref,
    w1d_ref, b1d_ref, w2d_ref, b2d_ref,
    out_ref,
):
    # rgb_ref/depth_ref/out_ref block: (Nb, C, HW)   (HW on lanes)
    # w1*: (Cr, C)   b1*: (1, Cr)   w2*: (C, Cr)   b2*: (1, C)
    rgb = rgb_ref[...]
    depth = depth_ref[...]

    def se_scale(x, w1, b1, w2, b2):
        # Squeeze: adaptive_avg_pool2d(x, 1) == mean over the full spatial dim
        # (each block carries the complete HW extent, so the mean is exact).
        pooled = jnp.mean(x.astype(jnp.float32), axis=-1)                 # (Nb, C)
        # Excite MLP. The contraction dims (C, Cr) are tiny relative to the
        # streamed data, so compute it as VPU broadcast-multiply + XLU lane
        # reduce instead of an MXU matvec (no MXU push / result-FIFO latency,
        # stays in f32).
        h = jnp.sum(pooled[:, None, :] * w1[None, :, :], axis=-1) + b1    # (Nb, Cr)
        h = jnp.maximum(h, 0.0)                                           # ReLU
        s = jnp.sum(h[:, None, :] * w2[None, :, :], axis=-1) + b2         # (Nb, C)
        return jax.nn.sigmoid(s)[:, :, None]                              # (Nb, C, 1)

    s_rgb = se_scale(rgb, w1r_ref[...], b1r_ref[...], w2r_ref[...], b2r_ref[...])
    s_dep = se_scale(depth, w1d_ref[...], b1d_ref[...], w2d_ref[...], b2d_ref[...])

    # Channel-wise rescale of both modalities + fusion add (single fused pass).
    out_ref[...] = (rgb * s_rgb + depth * s_dep).astype(out_ref.dtype)


def _choose_block_batch(N, C, Cr, HW, itemsize,
                        target_stream_bytes=4 << 20,
                        target_mlp_bytes=2 << 20):
    """Pick Nb so one streamed block is ~4 MiB, the excite-MLP broadcast
    intermediate stays ~<=2 MiB, Nb | N, and (when possible) the grid keeps
    >= 2 steps so both v7x TensorCores get work."""
    per_sample_stream = C * HW * itemsize
    per_sample_mlp = Cr * C * 4  # f32 (Nb, Cr, C) intermediate, per modality
    nb = max(1, min(N,
                    int(target_stream_bytes // max(per_sample_stream, 1)),
                    int(target_mlp_bytes // max(per_sample_mlp, 1))))
    while nb > 1 and (N + nb - 1) // nb < 2:
        nb -= 1
    while N % nb != 0:
        nb -= 1
    return nb


def squeeze_excite_fusion_add(rgb, depth, params):
    """rgb, depth: (N, C, H, W) float32. Returns (N, C, H, W)."""
    N, C, H, W = rgb.shape
    HW = H * W

    rgb_f = rgb.reshape(N, C, HW)
    depth_f = depth.reshape(N, C, HW)

    (w1r, b1r, w2r, b2r, w1d, b1d, w2d, b2d) = params
    Cr = w1r.shape[0]

    # Lane-dense bias rows (instead of (C,1) columns padded to (8,128) tiles).
    b1r2 = b1r.reshape(1, Cr)
    b2r2 = b2r.reshape(1, C)
    b1d2 = b1d.reshape(1, Cr)
    b2d2 = b2d.reshape(1, C)

    itemsize = jnp.dtype(rgb.dtype).itemsize
    nb = _choose_block_batch(N, C, Cr, HW, itemsize)
    grid = (N // nb,)

    # Explicit VMEM budget: 3 streamed arrays x 2 (double buffer) x block
    # + weights (x2 buffered) + MLP broadcast intermediates + headroom;
    # capped to fit v7x's 64 MiB physical VMEM.
    # TODO(synk): for very large feature maps (a single (C,HW) sample >~8 MiB)
    # split HW with a two-pass sum/scale scheme instead of one-shot blocks.
    block_bytes = nb * C * HW * itemsize
    weight_bytes = sum(int(a.size) * jnp.dtype(a.dtype).itemsize
                       for a in (w1r, b1r2, w2r, b2r2, w1d, b1d2, w2d, b2d2))
    mlp_bytes = 2 * nb * Cr * C * 4
    vmem_bytes = int(min(max(6 * block_bytes + 2 * weight_bytes
                             + 2 * mlp_bytes + (2 << 20),
                             16 << 20),
                         48 << 20))

    img_spec = pl.BlockSpec((nb, C, HW), lambda b: (b, 0, 0))
    full = lambda shape: pl.BlockSpec(shape, lambda b: (0, 0))

    out = pl.pallas_call(
        _se_fusion_kernel,
        out_shape=jax.ShapeDtypeStruct((N, C, HW), rgb.dtype),
        grid_spec=pltpu.PrefetchScalarGridSpec(
            num_scalar_prefetch=0,
            grid=grid,
            in_specs=[
                img_spec,               # rgb
                img_spec,               # depth
                full((Cr, C)),          # w1 rgb
                full((1, Cr)),          # b1 rgb
                full((C, Cr)),          # w2 rgb
                full((1, C)),           # b2 rgb
                full((Cr, C)),          # w1 depth
                full((1, Cr)),          # b1 depth
                full((C, Cr)),          # w2 depth
                full((1, C)),           # b2 depth
            ],
            out_specs=img_spec,
        ),
        compiler_params=pltpu.CompilerParams(
            dimension_semantics=("parallel",),
            vmem_limit_bytes=vmem_bytes,
        ),
    )(rgb_f, depth_f, w1r, b1r2, w2r, b2r2, w1d, b1d2, w2d, b2d2)

    return out.reshape(N, C, H, W)


def _reference(rgb, depth, params):
    """Pure-JAX reference matching the PyTorch forward."""
    (w1r, b1r, w2r, b2r, w1d, b1d, w2d, b2d) = params

    def se(x, w1, b1, w2, b2):
        pooled = jnp.mean(x, axis=(2, 3), keepdims=True)          # (N, C, 1, 1)
        p = pooled[:, :, 0, 0]                                    # (N, C)
        h = jnp.maximum(p @ w1.T + b1, 0.0)                       # (N, Cr)
        s = jax.nn.sigmoid(h @ w2.T + b2)                         # (N, C)
        return x * s[:, :, None, None]

    return se(rgb, w1r, b1r, w2r, b2r) + se(depth, w1d, b1d, w2d, b2d)


def _init_params(key, C, reduction=16):
    Cr = C // reduction
    ks = jax.random.split(key, 8)
    scale1 = 1.0 / jnp.sqrt(C)
    scale2 = 1.0 / jnp.sqrt(Cr)
    # Conv2d(C, Cr, 1).weight has shape (Cr, C, 1, 1) -> use (Cr, C)
    w1r = jax.random.normal(ks[0], (Cr, C), jnp.float32) * scale1
    b1r = jax.random.normal(ks[1], (Cr,), jnp.float32) * scale1
    w2r = jax.random.normal(ks[2], (C, Cr), jnp.float32) * scale2
    b2r = jax.random.normal(ks[3], (C,), jnp.float32) * scale2
    w1d = jax.random.normal(ks[4], (Cr, C), jnp.float32) * scale1
    b1d = jax.random.normal(ks[5], (Cr,), jnp.float32) * scale1
    w2d = jax.random.normal(ks[6], (C, Cr), jnp.float32) * scale2
    b2d = jax.random.normal(ks[7], (C,), jnp.float32) * scale2
    return (w1r, b1r, w2r, b2r, w1d, b1d, w2d, b2d)


if __name__ == "__main__":
    key = jax.random.PRNGKey(0)
    k_rgb, k_depth, k_params = jax.random.split(key, 3)

    N, C, H, W = 2, 32, 16, 16   # C=32 so channel // 16 = 2 (valid reduction)
    rgb = jax.random.normal(k_rgb, (N, C, H, W), jnp.float32)
    depth = jax.random.normal(k_depth, (N, C, H, W), jnp.float32)
    params = _init_params(k_params, C, reduction=16)

    out = squeeze_excite_fusion_add(rgb, depth, params)
    out = jax.block_until_ready(out)

    ref = _reference(rgb, depth, params)
    assert out.shape == (N, C, H, W)
    assert jnp.allclose(out, ref, atol=1e-5, rtol=1e-5), "mismatch vs reference"

    print("KERNEL_OK")
</pallas_src>

<mosaic_0001>
module attributes {stable_mosaic.version = 11 : i64} {
  func.func @_se_fusion_kernel(%arg0: i32, %arg1: memref<1x32x256xf32, #tpu.memory_space<vmem>>, %arg2: memref<1x32x256xf32, #tpu.memory_space<vmem>>, %arg3: memref<2x32xf32, #tpu.memory_space<vmem>>, %arg4: memref<1x2xf32, #tpu.memory_space<vmem>>, %arg5: memref<32x2xf32, #tpu.memory_space<vmem>>, %arg6: memref<1x32xf32, #tpu.memory_space<vmem>>, %arg7: memref<2x32xf32, #tpu.memory_space<vmem>>, %arg8: memref<1x2xf32, #tpu.memory_space<vmem>>, %arg9: memref<32x2xf32, #tpu.memory_space<vmem>>, %arg10: memref<1x32xf32, #tpu.memory_space<vmem>>, %arg11: memref<1x32x256xf32, #tpu.memory_space<vmem>>) attributes {dimension_semantics = [#tpu.dimension_semantics<parallel>], iteration_bounds = array<i64: 2>, scalar_prefetch = 0 : i64, scratch_operands = 0 : i64, tpu.core_type = #tpu.core_type<tc>, window_params = [{transform_indices = @transform_0, window_bounds = array<i64: 1, 32, 256>}, {transform_indices = @transform_1, window_bounds = array<i64: 1, 32, 256>}, {pipeline_mode = #tpu.pipeline_mode<synchronous>, transform_indices = @transform_2, window_bounds = array<i64: 2, 32>}, {pipeline_mode = #tpu.pipeline_mode<synchronous>, transform_indices = @transform_3, window_bounds = array<i64: 1, 2>}, {pipeline_mode = #tpu.pipeline_mode<synchronous>, transform_indices = @transform_4, window_bounds = array<i64: 32, 2>}, {pipeline_mode = #tpu.pipeline_mode<synchronous>, transform_indices = @transform_5, window_bounds = array<i64: 1, 32>}, {pipeline_mode = #tpu.pipeline_mode<synchronous>, transform_indices = @transform_6, window_bounds = array<i64: 2, 32>}, {pipeline_mode = #tpu.pipeline_mode<synchronous>, transform_indices = @transform_7, window_bounds = array<i64: 1, 2>}, {pipeline_mode = #tpu.pipeline_mode<synchronous>, transform_indices = @transform_8, window_bounds = array<i64: 32, 2>}, {pipeline_mode = #tpu.pipeline_mode<synchronous>, transform_indices = @transform_9, window_bounds = array<i64: 1, 32>}, {transform_indices = @transform_10, window_bounds = array<i64: 1, 32, 256>}]} {
    %c0 = arith.constant 0 : index
    %c0_0 = arith.constant 0 : index
    %c0_1 = arith.constant 0 : index
    %0 = vector.load %arg1[%c0, %c0_0, %c0_1] : memref<1x32x256xf32, #tpu.memory_space<vmem>>, vector<1x32x256xf32>
    %c0_2 = arith.constant 0 : index
    %c0_3 = arith.constant 0 : index
    %c0_4 = arith.constant 0 : index
    %1 = vector.load %arg2[%c0_2, %c0_3, %c0_4] : memref<1x32x256xf32, #tpu.memory_space<vmem>>, vector<1x32x256xf32>
    %c0_5 = arith.constant 0 : index
    %c0_6 = arith.constant 0 : index
    %2 = vector.load %arg3[%c0_5, %c0_6] : memref<2x32xf32, #tpu.memory_space<vmem>>, vector<2x32xf32>
    %c0_7 = arith.constant 0 : index
    %c0_8 = arith.constant 0 : index
    %3 = vector.load %arg4[%c0_7, %c0_8] : memref<1x2xf32, #tpu.memory_space<vmem>>, vector<1x2xf32>
    %c0_9 = arith.constant 0 : index
    %c0_10 = arith.constant 0 : index
    %4 = vector.load %arg5[%c0_9, %c0_10] : memref<32x2xf32, #tpu.memory_space<vmem>>, vector<32x2xf32>
    %c0_11 = arith.constant 0 : index
    %c0_12 = arith.constant 0 : index
    %5 = vector.load %arg6[%c0_11, %c0_12] : memref<1x32xf32, #tpu.memory_space<vmem>>, vector<1x32xf32>
    %cst = arith.constant dense<0.000000e+00> : vector<1x32xf32>
    %6 = vector.multi_reduction <add>, %0, %cst [2] : vector<1x32x256xf32> to vector<1x32xf32>
    %cst_13 = arith.constant 2.560000e+02 : f32
    %7 = vector.broadcast %cst_13 : f32 to vector<1x32xf32>
    %8 = arith.divf %6, %7 : vector<1x32xf32>
    %9 = vector.shape_cast %8 : vector<1x32xf32> to vector<1x1x32xf32>
    %10 = vector.shape_cast %2 : vector<2x32xf32> to vector<1x2x32xf32>
    %11 = vector.broadcast %9 : vector<1x1x32xf32> to vector<1x2x32xf32>
    %12 = arith.mulf %11, %10 : vector<1x2x32xf32>
    %cst_14 = arith.constant dense<0.000000e+00> : vector<1x2xf32>
    %13 = vector.multi_reduction <add>, %12, %cst_14 [2] : vector<1x2x32xf32> to vector<1x2xf32>
    %14 = arith.addf %13, %3 : vector<1x2xf32>
    %cst_15 = arith.constant 0.000000e+00 : f32
    %15 = vector.broadcast %cst_15 : f32 to vector<1x2xf32>
    %16 = arith.maximumf %14, %15 : vector<1x2xf32>
    %17 = vector.shape_cast %16 : vector<1x2xf32> to vector<1x1x2xf32>
    %18 = vector.shape_cast %4 : vector<32x2xf32> to vector<1x32x2xf32>
    %19 = vector.broadcast %17 : vector<1x1x2xf32> to vector<1x32x2xf32>
    %20 = arith.mulf %19, %18 : vector<1x32x2xf32>
    %cst_16 = arith.constant dense<0.000000e+00> : vector<1x32xf32>
    %21 = vector.multi_reduction <add>, %20, %cst_16 [2] : vector<1x32x2xf32> to vector<1x32xf32>
    %22 = arith.addf %21, %5 : vector<1x32xf32>
    %23 = arith.negf %22 : vector<1x32xf32>
    %24 = math.exp %23 : vector<1x32xf32>
    %cst_17 = arith.constant 1.000000e+00 : f32
    %25 = vector.broadcast %cst_17 : f32 to vector<1x32xf32>
    %26 = arith.addf %25, %24 : vector<1x32xf32>
    %27 = arith.divf %25, %26 : vector<1x32xf32>
    %28 = vector.shape_cast %27 : vector<1x32xf32> to vector<1x32x1xf32>
    %c0_18 = arith.constant 0 : index
    %c0_19 = arith.constant 0 : index
    %29 = vector.load %arg7[%c0_18, %c0_19] : memref<2x32xf32, #tpu.memory_space<vmem>>, vector<2x32xf32>
    %c0_20 = arith.constant 0 : index
    %c0_21 = arith.constant 0 : index
    %30 = vector.load %arg8[%c0_20, %c0_21] : memref<1x2xf32, #tpu.memory_space<vmem>>, vector<1x2xf32>
    %c0_22 = arith.constant 0 : index
    %c0_23 = arith.constant 0 : index
    %31 = vector.load %arg9[%c0_22, %c0_23] : memref<32x2xf32, #tpu.memory_space<vmem>>, vector<32x2xf32>
    %c0_24 = arith.constant 0 : index
    %c0_25 = arith.constant 0 : index
    %32 = vector.load %arg10[%c0_24, %c0_25] : memref<1x32xf32, #tpu.memory_space<vmem>>, vector<1x32xf32>
    %cst_26 = arith.constant dense<0.000000e+00> : vector<1x32xf32>
    %33 = vector.multi_reduction <add>, %1, %cst_26 [2] : vector<1x32x256xf32> to vector<1x32xf32>
    %cst_27 = arith.constant 2.560000e+02 : f32
    %34 = vector.broadcast %cst_27 : f32 to vector<1x32xf32>
    %35 = arith.divf %33, %34 : vector<1x32xf32>
    %36 = vector.shape_cast %35 : vector<1x32xf32> to vector<1x1x32xf32>
    %37 = vector.shape_cast %29 : vector<2x32xf32> to vector<1x2x32xf32>
    %38 = vector.broadcast %36 : vector<1x1x32xf32> to vector<1x2x32xf32>
    %39 = arith.mulf %38, %37 : vector<1x2x32xf32>
    %cst_28 = arith.constant dense<0.000000e+00> : vector<1x2xf32>
    %40 = vector.multi_reduction <add>, %39, %cst_28 [2] : vector<1x2x32xf32> to vector<1x2xf32>
    %41 = arith.addf %40, %30 : vector<1x2xf32>
    %cst_29 = arith.constant 0.000000e+00 : f32
    %42 = vector.broadcast %cst_29 : f32 to vector<1x2xf32>
    %43 = arith.maximumf %41, %42 : vector<1x2xf32>
    %44 = vector.shape_cast %43 : vector<1x2xf32> to vector<1x1x2xf32>
    %45 = vector.shape_cast %31 : vector<32x2xf32> to vector<1x32x2xf32>
    %46 = vector.broadcast %44 : vector<1x1x2xf32> to vector<1x32x2xf32>
    %47 = arith.mulf %46, %45 : vector<1x32x2xf32>
    %cst_30 = arith.constant dense<0.000000e+00> : vector<1x32xf32>
    %48 = vector.multi_reduction <add>, %47, %cst_30 [2] : vector<1x32x2xf32> to vector<1x32xf32>
    %49 = arith.addf %48, %32 : vector<1x32xf32>
    %50 = arith.negf %49 : vector<1x32xf32>
    %51 = math.exp %50 : vector<1x32xf32>
    %cst_31 = arith.constant 1.000000e+00 : f32
    %52 = vector.broadcast %cst_31 : f32 to vector<1x32xf32>
    %53 = arith.addf %52, %51 : vector<1x32xf32>
    %54 = arith.divf %52, %53 : vector<1x32xf32>
    %55 = vector.shape_cast %54 : vector<1x32xf32> to vector<1x32x1xf32>
    %56 = vector.broadcast %28 : vector<1x32x1xf32> to vector<1x32x256xf32>
    %57 = arith.mulf %0, %56 : vector<1x32x256xf32>
    %58 = vector.broadcast %55 : vector<1x32x1xf32> to vector<1x32x256xf32>
    %59 = arith.mulf %1, %58 : vector<1x32x256xf32>
    %60 = arith.addf %57, %59 : vector<1x32x256xf32>
    %c0_32 = arith.constant 0 : index
    %c0_33 = arith.constant 0 : index
    %c0_34 = arith.constant 0 : index
    %61 = vector.load %arg11[%c0_32, %c0_33, %c0_34] : memref<1x32x256xf32, #tpu.memory_space<vmem>>, vector<1x32x256xf32>
    tpu.vector_store %arg11[%c0_32, %c0_33, %c0_34], %60 {strides = array<i32>} : memref<1x32x256xf32, #tpu.memory_space<vmem>>, vector<1x32x256xf32>,
    return
  }
  func.func @transform_0(%arg0: i32) -> (i32, i32, i32) {
    %c0_i32 = arith.constant 0 : i32
    %c0_i32_0 = arith.constant 0 : i32
    %c0_i32_1 = arith.constant 0 : i32
    return %arg0, %c0_i32, %c0_i32_0 : i32, i32, i32
  }
  func.func @transform_1(%arg0: i32) -> (i32, i32, i32) {
    %c0_i32 = arith.constant 0 : i32
    %c0_i32_0 = arith.constant 0 : i32
    %c0_i32_1 = arith.constant 0 : i32
    return %arg0, %c0_i32, %c0_i32_0 : i32, i32, i32
  }
  func.func @transform_2(%arg0: i32) -> (i32, i32) {
    %c0_i32 = arith.constant 0 : i32
    %c0_i32_0 = arith.constant 0 : i32
    %c0_i32_1 = arith.constant 0 : i32
    return %c0_i32, %c0_i32_0 : i32, i32
  }
  func.func @transform_3(%arg0: i32) -> (i32, i32) {
    %c0_i32 = arith.constant 0 : i32
    %c0_i32_0 = arith.constant 0 : i32
    %c0_i32_1 = arith.constant 0 : i32
    return %c0_i32, %c0_i32_0 : i32, i32
  }
  func.func @transform_4(%arg0: i32) -> (i32, i32) {
    %c0_i32 = arith.constant 0 : i32
    %c0_i32_0 = arith.constant 0 : i32
    %c0_i32_1 = arith.constant 0 : i32
    return %c0_i32, %c0_i32_0 : i32, i32
  }
  func.func @transform_5(%arg0: i32) -> (i32, i32) {
    %c0_i32 = arith.constant 0 : i32
    %c0_i32_0 = arith.constant 0 : i32
    %c0_i32_1 = arith.constant 0 : i32
    return %c0_i32, %c0_i32_0 : i32, i32
  }
  func.func @transform_6(%arg0: i32) -> (i32, i32) {
    %c0_i32 = arith.constant 0 : i32
    %c0_i32_0 = arith.constant 0 : i32
    %c0_i32_1 = arith.constant 0 : i32
    return %c0_i32, %c0_i32_0 : i32, i32
  }
  func.func @transform_7(%arg0: i32) -> (i32, i32) {
    %c0_i32 = arith.constant 0 : i32
    %c0_i32_0 = arith.constant 0 : i32
    %c0_i32_1 = arith.constant 0 : i32
    return %c0_i32, %c0_i32_0 : i32, i32
  }
  func.func @transform_8(%arg0: i32) -> (i32, i32) {
    %c0_i32 = arith.constant 0 : i32
    %c0_i32_0 = arith.constant 0 : i32
    %c0_i32_1 = arith.constant 0 : i32
    return %c0_i32, %c0_i32_0 : i32, i32
  }
  func.func @transform_9(%arg0: i32) -> (i32, i32) {
    %c0_i32 = arith.constant 0 : i32
    %c0_i32_0 = arith.constant 0 : i32
    %c0_i32_1 = arith.constant 0 : i32
    return %c0_i32, %c0_i32_0 : i32, i32
  }
  func.func @transform_10(%arg0: i32) -> (i32, i32, i32) {
    %c0_i32 = arith.constant 0 : i32
    %c0_i32_0 = arith.constant 0 : i32
    %c0_i32_1 = arith.constant 0 : i32
    return %arg0, %c0_i32, %c0_i32_0 : i32, i32, i32
  }
}

</mosaic_0001>

<bundles_post_ra>
// kernel: tpu_custom_call.1
= control target key start
LH: loop header
LB: loop body
LE: loop exit
PB: predicated region body
PF: predicated region fallthrough
CT: control target
= control target key end

     0   :  { %s3394_s0 = inlined_call_operand.hbm [shape: f32[2,32,256], index: 0, kind: input, shape index: {}]   ;;  %s3395_s1 = inlined_call_operand.hbm [shape: f32[2,32,256], index: 1, kind: input, shape index: {}]   ;;  %s3396_s2 = inlined_call_operand.vmem [shape: f32[2,32], index: 2, kind: input, shape index: {}]   ;;  %s3397_s3 = inlined_call_operand.vmem [shape: f32[1,2], index: 3, kind: input, shape index: {}]   ;;  %s3398_s4 = inlined_call_operand.vmem [shape: f32[32,2], index: 4, kind: input, shape index: {}]   ;;  %s3399_s5 = inlined_call_operand.vmem [shape: f32[1,32], index: 5, kind: input, shape index: {}]   ;;  %s3400_s6 = inlined_call_operand.vmem [shape: f32[2,32], index: 6, kind: input, shape index: {}]   ;;  %s3401_s7 = inlined_call_operand.vmem [shape: f32[1,2], index: 7, kind: input, shape index: {}]   ;;  %s3402_s8 = inlined_call_operand.vmem [shape: f32[32,2], index: 8, kind: input, shape index: {}]   ;;  %s3403_s9 = inlined_call_operand.vmem [shape: f32[1,32], index: 9, kind: input, shape index: {}]   ;;  %s3404_s10 = inlined_call_operand.hbm [shape: f32[2,32,256], index: 10, kind: output, shape index: {}]  }
   0x1   :  { %3415 = sst [smem:[#allocation21_spill]] %s3394_s0 }
   0x2   :  { %15 = vsyncpa [#allocation3], 0 }
   0x3   :  { %17 = vsyncpa [#allocation3 + $0x1], 0 }
   0x4   :  { %18 = vsyncpa [#allocation6], 0 }
   0x5   :  { %20 = vsyncpa [#allocation6 + $0x1], 0 }
   0x6   :  { %21 = vsyncpa [#allocation4], 0 }
   0x7   :  { %23 = vsyncpa [#allocation4 + $0x1], 0  ;;  %s2578_s13 = smov 0   ;;  %s2580_s14 = smov 0  }
   0x8   :  { %s2582_s15 = smov 0   ;;  %s2584_s16 = smov 0  }
   0x9 LB: > { %3416 = sst [smem:[#allocation11_spill]] %s2509_s15  ;;  %s2599_s17 = sadd.s32 4294967295, %s2513_s16   ;;  %s2513_s16 = sphi %s2584_s16, %s3449_s16   ;;  %s2509_s15 = sphi %s2582_s15, %s3451_s15   ;;  %s2505_s14 = sphi %s2580_s14, %s3453_s14   ;;  %s2501_s13 = sphi %s2578_s13, %s3452_s13  }
   0xa   : > { %s2250_s18 = sadd.s32 4294967294, %s2513_s16   ;;  %s2603_s19 = sadd.s32 1, %s2513_s16  }
   0xb   : > { %3417 = sst [smem:[#allocation12_spill]] %s2603_s19  ;;  %s36_s20 = sadd.s32 1, %s2509_s15 }
   0xc   : > { %s33_s21 = ssub.s32 %s2513_s16, %s2603_s19  ;;  %p43_p0 = scmp.ne.s32.totalorder %s2509_s15, %s2505_s14 }
   0xd   : > { %p34_p1 = scmp.eq.s32.totalorder %s33_s21, 0  ;;  %p44_p2 = scmp.eq.s32.totalorder %s2513_s16, 0 }
   0xe   : > { %p49_p3 = scmp.ne.s32.totalorder %s2505_s14, %s2501_s13  ;;  %p50_p4 = scmp.eq.s32.totalorder %s2599_s17, 0 }
   0xf   : > { %s2615_s22 = scalar_select %p34_p1, %s2509_s15, %s36_s20  }
  0x10   : > { %p2617_p5 = por %p44_p2, %p43_p0  ;;  %p2621_p6 = por %p50_p4, %p49_p3 }
  0x11   : > { %3418 = sst [smem:[#allocation13_spill]] %s2615_s22  ;;  %p267_p7 = scmp.eq.s32.totalorder %s2599_s17, 1 }
  0x12   : > { %s3420_s24 = scalar_select %p2621_p6, 1, 0 }
  0x13   : > { %p273_p8 = scmp.eq.s32.totalorder %s2250_s18, 1  ;;  %p2300_p10 = scmp.lt.s32.totalorder %s2513_s16, 2 }
  0x14   : > { %p2628_p11 = por %p267_p7, %p43_p0  ;;  %s2637_s27 = sand.u32 1, %s2509_s15  }
  0x15   : > { %p2632_p12 = por %p273_p8, %p49_p3  ;;  %s3407_s28 = sshll.u32 %s2513_s16, 10 }
  0x16   : > { %s3421_s25 = scalar_select %p2628_p11, 1, 0 }
  0x17   : > { %s3422_s26 = scalar_select %p2632_p12, 1, 0 }
  0x18   : > { %s3406_s29 = sshll.u32 %s2637_s27, 6  ;;  %s3424_s0 = sld [smem:[#allocation21_spill]] }
  0x19   : > { %3423 = sst [smem:[#allocation14_spill]] %s3422_s26  ;;  %s321_s18 = scalar_lea.vmem [#allocation2], %s3406_s29 }
  0x1a   : > { %s328_s20 = sshll.u32 %s321_s18, 4  ;;  %p2652_p13 = pnand %p2300_p10, %p2617_p5  ;;  %s2656_s20 = int_to_ptr.vmem [resolvable:$true] %s328_s20 }
  0x1c   : > { %p2391_p1 = pneg %p2652_p13 }
  0x1e   : > { %s2646_s12 = scalar_lea.hbm %s3424_s0, %s3407_s28  ;;  %s2394_s23 = scalar_lea.hbm %s3424_s0, 2048 }
  0x1f   : > { %s2389_s15 = scalar_lea.hbm %s2646_s12, 1024  ;;  %p2395_p4 = scmp.lt.s32.totalorder %s2646_s12, %s3424_s0 }
  0x20   : > { %p2390_p0 = scmp.ne.s32.totalorder %s2646_s12, %s2389_s15  ;;  %p2396_p5 = scmp.lt.s32.totalorder %s2394_s23, %s2389_s15 }
  0x22   : > { %p2392_p2 = pnand %p2391_p1, %p2390_p0  ;;  %p2397_p7 = por %p2396_p5, %p2395_p4 }
  0x24   : > { %p2393_p3 = pneg %p2392_p2 }
  0x26   : > { %p2398_p8 = pnand %p2397_p7, %p2393_p3 }
  0x28   : > { %2401 = shalt.err (!%p2398_p8)
}
  0x29   : > { %s2402_s28 = scalar_lea.vmem %s2656_s20, 1024  ;;  %s2515_s30 = smov [#allocation2]  }
  0x2a   : > { %p2403_p10 = scmp.ne.s32.totalorder %s2656_s20, %s2402_s28  ;;  %s2407_s11 = sshll.u32 %s2515_s30, 4  ;;  %s2408_s11 = int_to_ptr.vmem [resolvable:$false] %s2407_s11 }
  0x2b   : > { %s2409_s22 = scalar_lea.vmem %s2408_s11, 2048  ;;  %p2410_p9 = scmp.lt.s32.totalorder %s2656_s20, %s2408_s11 }
  0x2c   : > { %p2405_p0 = pnand %p2403_p10, %p2391_p1  ;;  %p2411_p12 = scmp.lt.s32.totalorder %s2409_s22, %s2402_s28 }
  0x2e   : > { %p2406_p2 = pneg %p2405_p0  ;;  %p2412_p11 = por %p2411_p12, %p2410_p9 }
  0x30   : > { %p2413_p4 = pnand %p2412_p11, %p2406_p2 }
  0x32   : > { %2416 = shalt.err (!%p2413_p4)
}
  0x33   : > { %s3412_s15 = smov 256   ;;  %s2517_s29 = smov 16  }
  0x34   : > { %s3426_s22 = scalar_lea.sflag [#allocation3], %s2637_s27  ;;  %p2259_p9 = scmp.ge.s32.totalorder %s2513_s16, 1 }
  0x35   : > { %2292 = dma.hbm_to_vmem [thread:$0]  (!%p2652_p13), %s2646_s12, 1024, %s2656_s20, %s3426_s22, %s3412_s15, %s3412_s15, %s2517_s29  }
  0x36   : > { %p357_p11 = scmp.lt.s32.totalorder %s2513_s16, 3  ;;  %s3428_s23 = sshll.u32 %s2513_s16, 10 }
  0x37   : > { %s2699_s11 = scalar_lea.hbm %s3395_s1, %s3428_s23  ;;  %s3429_s0 = sshll.u32 %s2637_s27, 6 }
  0x38   : > { %p2690_p12 = pnand %p2259_p9, %p357_p11  ;;  %s342_s19 = scalar_lea.vmem [#allocation5], %s3429_s0 }
  0x39   : > { %s349_s26 = sshll.u32 %s342_s19, 4  ;;  %s339_s12 = scalar_lea.sflag [#allocation6], %s2637_s27  ;;  %s2703_s26 = int_to_ptr.vmem [resolvable:$true] %s349_s26 }
  0x3a   : > { %s2417_s20 = scalar_lea.hbm %s2699_s11, 1024  ;;  %s2422_s23 = scalar_lea.hbm %s3395_s1, 2048 }
  0x3b   : > { %p2418_p3 = scmp.ne.s32.totalorder %s2699_s11, %s2417_s20  ;;  %p2423_p8 = scmp.lt.s32.totalorder %s2699_s11, %s3395_s1 }
  0x3c   : > { %p2424_p10 = scmp.lt.s32.totalorder %s2422_s23, %s2417_s20 }
  0x3d   : > { %p2420_p5 = pnand %p2418_p3, %p2391_p1 }
  0x3e   : > { %p2425_p0 = por %p2424_p10, %p2423_p8 }
  0x3f   : > { %p2421_p7 = pneg %p2420_p5 }
  0x41   : > { %p2426_p2 = pnand %p2425_p0, %p2421_p7 }
  0x43   : > { %2429 = shalt.err (!%p2426_p2)
}
  0x44   : > { %s2430_s0 = scalar_lea.vmem %s2703_s26, 1024  ;;  %s2518_s19 = smov [#allocation5]  }
  0x45   : > { %p2431_p4 = scmp.ne.s32.totalorder %s2703_s26, %s2430_s0  ;;  %s2435_s27 = sshll.u32 %s2518_s19, 4  ;;  %s2436_s27 = int_to_ptr.vmem [resolvable:$false] %s2435_s27 }
  0x46   : > { %s2437_s15 = scalar_lea.vmem %s2436_s27, 2048  ;;  %p2438_p3 = scmp.lt.s32.totalorder %s2703_s26, %s2436_s27 }
  0x47   : > { %p2433_p9 = pnand %p2431_p4, %p2391_p1  ;;  %p2439_p5 = scmp.lt.s32.totalorder %s2437_s15, %s2430_s0 }
  0x49   : > { %p2434_p11 = pneg %p2433_p9  ;;  %p2440_p6 = por %p2439_p5, %p2438_p3 }
  0x4b   : > { %p2441_p8 = pnand %p2440_p6, %p2434_p11 }
  0x4d   : > { %2444 = shalt.err (!%p2441_p8)
}
  0x4e   : > { %s3430_s20 = smov 256   ;;  %361 = sbr.rel (%p2690_p12) target bundleno = 1215 (0x4bf), region = 60 }
  0x4f   : > { %2295 = dma.hbm_to_vmem [thread:$0]  (!%p2652_p13), %s2699_s11, 1024, %s2703_s26, %s339_s12, %s3430_s20, %s3430_s20, %s2517_s29  }
  0x53   : > { %s2734_s22 = sand.u32 1, %s2505_s14   ;;  %p3431_p6 = scmp.ne.s32.totalorder %s3420_s24, 0 }
  0x54   : > { %s2737_s23 = sshll.u32 %s2734_s22, 6  ;;  %s364_s18 = scalar_lea.sflag [#allocation3], %s2734_s22 }
  0x55   : > { %s2741_s21 = scalar_lea.vmem [#allocation2], %s2737_s23 }
  0x56   : > { %2488 = dma.done.wait (%p3431_p6), %s364_s18, 1024  }
  0x57   : > { %2490 = vsyncadd (%p3431_p6), %s364_s18, 4294966272  ;;  %s373_s26 = scalar_lea.sflag [#allocation6], %s2734_s22  ;;  %s2749_s29 = scalar_lea.vmem [#allocation5], %s2737_s23 }
  0x58   : > { %2492 = dma.done.wait (%p3431_p6), %s373_s26, 1024  }
  0x59   : > { %2494 = vsyncadd (%p3431_p6), %s373_s26, 4294966272  ;;  %v422_v0 = vld [vmem:[%s2741_s21 + $0x20] sm:$0xff]  ;;  %v423_v1 = vld [vmem:[%s2741_s21 + $0x28] sm:$0xff]  ;;  %v3414_v12 = vlaneseq  ;;  %v2519_v17 = vmov 0   ;;  %vm556_vm0 = vcmask 130112   ;;  %vm563_vm1 = vcmask 195712  }
  0x5a   : > { %v418_v2 = vld [vmem:[%s2741_s21] sm:$0xff]  ;;  %v447_v3 = vadd.f32 %v423_v1, %v422_v0  ;;  %v419_v4 = vld [vmem:[%s2741_s21 + $0x8] sm:$0xff]  ;;  %v424_v5 = vld [vmem:[%s2741_s21 + $0x30] sm:$0xff]  ;;  %2340 = vset.pattern.permute.xlu1 %v2519_v17  ;;  %2339 = vset.pattern.permute.xlu0 %v2519_v17  ;;  %vm570_vm2 = vcmask 261312   ;;  %vm591_vm3 = vcmask 1041409   ;;  %vm594_vm4 = vcmask 254976  }
  0x5b   : > { %v425_v6 = vld [vmem:[%s2741_s21 + $0x38] sm:$0xff]  ;;  %v441_v7 = vadd.f32 %v419_v4, %v418_v2  ;;  %v420_v8 = vld [vmem:[%s2741_s21 + $0x10] sm:$0xff]  ;;  %v2764_v13 = vshrl.u32 %v3414_v12, 7  ;;  %v434_v15 = vld [vmem:[%s3396_s2] sm:$0x3]  ;;  %vm1158_vm5 = vcmask 1042434  }
  0x5c   : > { %v421_v9 = vld [vmem:[%s2741_s21 + $0x18] sm:$0xff]  ;;  %448 = vadd.xlane.f32.xlu1 %v447_v3  ;;  %v450_v10 = vadd.f32 %v425_v6, %v424_v5  ;;  %v437_v20 = vld [vmem:[%s3398_s4 + $0x8] sm:$0xff]  ;;  %v2263_v21 = vld [vmem:[%s3397_s3] ss:$0 sm:$0xff]  ;;  %vm1160_vm6 = vcmask 1043459   ;;  %vm1162_vm7 = vcmask 1044484  }
  0x5d   : > { %442 = vadd.xlane.f32.xlu0 %v441_v7  ;;  %v444_v11 = vadd.f32 %v421_v9, %v420_v8  ;;  %v2767_v14 = vsub.s32 0, %v2764_v13  ;;  %v2774_v18 = vsub.s32 1, %v2764_v13  ;;  %v436_v22 = vld [vmem:[%s3398_s4] sm:$0xff]  ;;  %v2788_v24 = vsub.s32 6, %v2764_v13  ;;  %v2795_v27 = vld [vmem:[%s3398_s4 + $0x10] sm:$0xff]  ;;  %v439_v40 = vld [vmem:[%s3398_s4 + $0x18] sm:$0xff] }
  0x5e   : > { %v2799_v29 = vsub.s32 2, %v2764_v13  ;;  %v2805_v32 = vsub.s32 3, %v2764_v13  ;;  %v2811_v35 = vsub.s32 4, %v2764_v13  ;;  %v2817_v38 = vsub.s32 5, %v2764_v13  ;;  %v426_v58 = vld [vmem:[%s2749_s29] sm:$0xff]  ;;  %v427_v59 = vld [vmem:[%s2749_s29 + $0x8] sm:$0xff] }
  0x5f   : > { %v462_v16 = vrot.slane %v434_v15, %v2767_v14  ;;  %v481_v19 = vrot.slane %v434_v15, %v2774_v18  ;;  %v672_v23 = vrot.slane %v437_v20, %v2767_v14  ;;  %v616_v25 = vrot.slane %v436_v22, %v2767_v14  ;;  %v432_v62 = vld [vmem:[%s2749_s29 + $0x30] sm:$0xff]  ;;  %v433_v63 = vld [vmem:[%s2749_s29 + $0x38] sm:$0xff]  ;;  %s3326_s30 = scalar_lea.vmem [#allocation7], %s2737_s23  ;;  %s2282_s23 = sshll.u32 %s2599_s17, 10 }
  0x60   : > { %451 = vadd.xlane.f32.xlu1 %v450_v10  ;;  %v714_v26 = vrot.slane %v437_v20, %v2788_v24  ;;  %v623_v28 = vrot.slane %v436_v22, %v2774_v18  ;;  %v728_v30 = vrot.slane %v2795_v27, %v2767_v14  ;;  %v630_v31 = vrot.slane %v436_v22, %v2799_v29  ;;  %s2154_s0 = sshll.u32 %s3326_s30, 4  ;;  %s3345_s17 = scalar_lea.hbm %s3404_s10, %s2282_s23  ;;  %s3347_s0 = int_to_ptr.vmem [resolvable:$true] %s2154_s0 }
  0x61   : > { %445 = vadd.xlane.f32.xlu0 %v444_v11  ;;  %v742_v33 = vrot.slane %v2795_v27, %v2799_v29  ;;  %v637_v34 = vrot.slane %v436_v22, %v2805_v32  ;;  %v756_v36 = vrot.slane %v2795_v27, %v2811_v35  ;;  %v644_v37 = vrot.slane %v436_v22, %v2811_v35  ;;  %s2445_s15 = scalar_lea.vmem %s3347_s0, 1024  ;;  %p3445_p1 = scmp.ne.s32.totalorder %s3421_s25, 0 }
  0x62   : > { %v770_v39 = vrot.slane %v2795_v27, %v2788_v24  ;;  %v651_v41 = vrot.slane %v436_v22, %v2817_v38  ;;  %v784_v42 = vrot.slane %v439_v40, %v2767_v14  ;;  %v658_v43 = vrot.slane %v436_v22, %v2788_v24  ;;  %p2446_p13 = scmp.ne.s32.totalorder %s3347_s0, %s2445_s15 }
  0x63   : > { %v2828_v44 = vsub.s32 7, %v2764_v13  ;;  %v798_v45 = vrot.slane %v439_v40, %v2799_v29  ;;  %v812_v47 = vrot.slane %v439_v40, %v2811_v35  ;;  %v679_v48 = vrot.slane %v437_v20, %v2774_v18 }
  0x64   : > { %v826_v49 = vrot.slane %v439_v40, %v2788_v24  ;;  %v686_v50 = vrot.slane %v437_v20, %v2799_v29  ;;  %v693_v51 = vrot.slane %v437_v20, %v2805_v32  ;;  %v700_v52 = vrot.slane %v437_v20, %v2811_v35  ;;  %p2447_p12 = pnand %p2446_p13, %p3445_p1 }
  0x65   : > { %v665_v46 = vrot.slane %v436_v22, %v2828_v44  ;;  %v707_v53 = vrot.slane %v437_v20, %v2817_v38  ;;  %v721_v54 = vrot.slane %v437_v20, %v2828_v44  ;;  %v735_v55 = vrot.slane %v2795_v27, %v2774_v18  ;;  %v429_v22 = vld [vmem:[%s2749_s29 + $0x18] sm:$0xff] }
  0x66   : > { %v749_v56 = vrot.slane %v2795_v27, %v2805_v32  ;;  %v763_v57 = vrot.slane %v2795_v27, %v2817_v38  ;;  %v777_v60 = vrot.slane %v2795_v27, %v2828_v44  ;;  %v1267_v61 = vadd.f32 %v427_v59, %v426_v58  ;;  %p2448_p7 = pneg %p2447_p12 }
  0x67   : > { %v791_v0 = vrot.slane %v439_v40, %v2774_v18  ;;  %v1276_v1 = vadd.f32 %v433_v63, %v432_v62  ;;  %v805_v2 = vrot.slane %v439_v40, %v2805_v32  ;;  %v819_v3 = vrot.slane %v439_v40, %v2817_v38 }
  0x68   : > { %v833_v4 = vrot.slane %v439_v40, %v2828_v44  ;;  %vm1164_vm8 = vcmask 1045509   ;;  %vm1166_vm9 = vcmask 1046534   ;;  %vm1168_vm10 = vcmask 1047559  }
  0x69   : > { %vm1195_vm11 = vcmask 15360  }
  0x71   : > { %468 = vbcast.lane.b32.xlu1 %v462_v16, 264 }
  0x75   : > { %472 = vbcast.lane.b32.xlu1 %v462_v16, 272 }
  0x77   : > { %464 = vbcast.lane.b32.xlu0 %v462_v16, 256 }
  0x79   : > { %476 = vbcast.lane.b32.xlu1 %v462_v16, 280 }
  0x7b   : > { %483 = vbcast.lane.b32.xlu0 %v481_v19, 256 }
  0x7d   : > { %487 = vbcast.lane.b32.xlu1 %v481_v19, 264 }
  0x7f   : > { %491 = vbcast.lane.b32.xlu0 %v481_v19, 272 }
  0x81   : > { %495 = vbcast.lane.b32.xlu1 %v481_v19, 280 }
  0x83   : > { %604 = vbcast.lane.b32.xlu0 %v2263_v21, 256  ;;  %v428_v21 = vld [vmem:[%s2749_s29 + $0x10] sm:$0xff] }
  0x84   : > { %v1270_v27 = vadd.f32 %v429_v22, %v428_v21 }
  0x85   : > { %674 = vbcast.lane.b32.xlu1 %v672_v23, 256 }
  0x87   : > { %618 = vbcast.lane.b32.xlu0 %v616_v25, 256 }
  0x89   : > { %716 = vbcast.lane.b32.xlu1 %v714_v26, 256 }
  0x8b   : > { %625 = vbcast.lane.b32.xlu0 %v623_v28, 256  ;;  %v430_v28 = vld [vmem:[%s2749_s29 + $0x20] sm:$0xff] }
  0x8d   : > { %730 = vbcast.lane.b32.xlu1 %v728_v30, 256  ;;  %v431_v30 = vld [vmem:[%s2749_s29 + $0x28] sm:$0xff] }
  0x8f   : > { %632 = vbcast.lane.b32.xlu0 %v630_v31, 256  ;;  %v1260_v31 = vld [vmem:[%s3400_s6] sm:$0x3] }
  0x91   : > { %744 = vbcast.lane.b32.xlu1 %v742_v33, 256 }
  0x93   : > { %639 = vbcast.lane.b32.xlu0 %v637_v34, 256  ;;  %v1273_v34 = vadd.f32 %v431_v30, %v430_v28 }
  0x95   : > { %758 = vbcast.lane.b32.xlu1 %v756_v36, 256 }
  0x97   : > { %646 = vbcast.lane.b32.xlu0 %v644_v37, 256  ;;  %v1287_v37 = vrot.slane %v1260_v31, %v2767_v14 }
  0x99   : > { %772 = vbcast.lane.b32.xlu1 %v770_v39, 256  ;;  %v1306_v39 = vrot.slane %v1260_v31, %v2774_v18 }
  0x9b   : > { %653 = vbcast.lane.b32.xlu0 %v651_v41, 256 }
  0x9d   : > { %786 = vbcast.lane.b32.xlu1 %v784_v42, 256 }
  0x9f   : > { %660 = vbcast.lane.b32.xlu0 %v658_v43, 256 }
  0xa1   : > { %800 = vbcast.lane.b32.xlu1 %v798_v45, 256 }
  0xa3   : > { %667 = vbcast.lane.b32.xlu0 %v665_v46, 256 }
  0xa5   : > { %814 = vbcast.lane.b32.xlu1 %v812_v47, 256 }
  0xa7   : > { %681 = vbcast.lane.b32.xlu0 %v679_v48, 256 }
  0xa9   : > { %828 = vbcast.lane.b32.xlu1 %v826_v49, 256 }
  0xab   : > { %688 = vbcast.lane.b32.xlu0 %v686_v50, 256 }
  0xaf   : > { %695 = vbcast.lane.b32.xlu0 %v693_v51, 256 }
  0xb3   : > { %702 = vbcast.lane.b32.xlu0 %v700_v52, 256 }
  0xb7   : > { %709 = vbcast.lane.b32.xlu0 %v707_v53, 256 }
  0xbb   : > { %723 = vbcast.lane.b32.xlu0 %v721_v54, 256 }
  0xbf   : > { %737 = vbcast.lane.b32.xlu0 %v735_v55, 256 }
  0xc3   : > { %751 = vbcast.lane.b32.xlu0 %v749_v56, 256 }
  0xc7   : > { %765 = vbcast.lane.b32.xlu0 %v763_v57, 256 }
  0xcb   : > { %779 = vbcast.lane.b32.xlu0 %v777_v60, 256 }
  0xcd   : > { %1268 = vadd.xlane.f32.xlu1 %v1267_v61 }
  0xcf   : > { %793 = vbcast.lane.b32.xlu0 %v791_v0, 256 }
  0xd1   : > { %1277 = vadd.xlane.f32.xlu1 %v1276_v1 }
  0xd3   : > { %807 = vbcast.lane.b32.xlu0 %v805_v2, 256 }
  0xd7   : > { %821 = vbcast.lane.b32.xlu0 %v819_v3, 256 }
  0xdb   : > { %835 = vbcast.lane.b32.xlu0 %v833_v4, 256 }
  0xe5   : > { %v449_v5 = vpop.xlane.xlu1 %448 }
  0xe6   : > { %v443_v6 = vpop.xlane.xlu0 %442  ;;  %v456_v11 = vmul.f32 0.00390625, %v449_v5 }
  0xe7   : > { %v454_v23 = vmul.f32 0.00390625, %v443_v6 }
  0xe9   : > { %v452_v7 = vpop.xlane.xlu1 %451 }
  0xea   : > { %v446_v8 = vpop.xlane.xlu0 %445  ;;  %v457_v45 = vmul.f32 0.00390625, %v452_v7 }
  0xeb   : > { %v455_v9 = vmul.f32 0.00390625, %v446_v8 }
  0xed   : > { %v469_v10 = vpop.permute.xlu1 %468 }
  0xee   : > { %v506_v15 = vmul.f32 %v469_v10, %v455_v9  ;;  %v465_v16 = vpop.permute.xlu0 %464 }
  0xef   : > { %v505_v46 = vmul.f32 %v465_v16, %v454_v23 }
  0xf0   : > { %525 = vperm.xlu1 %2340, %v506_v15  }
  0xf1   : > { %v473_v17 = vpop.permute.xlu1 %472 }
  0xf2   : > { %v507_v19 = vmul.f32 %v473_v17, %v456_v11  ;;  %v484_v20 = vpop.permute.xlu0 %483 }
  0xf3   : > { %v509_v25 = vmul.f32 %v484_v20, %v454_v23 }
  0xf4   : > { %528 = vperm.xlu1 %2340, %v507_v19  }
  0xf5   : > { %v477_v43 = vpop.permute.xlu1 %476 }
  0xf6   : > { %v492_v26 = vpop.permute.xlu0 %491  ;;  %v508_v48 = vmul.f32 %v477_v43, %v457_v45 }
  0xf7   : > { %v511_v33 = vmul.f32 %v492_v26, %v456_v11 }
  0xf8   : > { %534 = vperm.xlu1 %2340, %v509_v25  }
  0xf9   : > { %v488_v49 = vpop.permute.xlu1 %487 }
  0xfa   : > { %1271 = vadd.xlane.f32.xlu0 %v1270_v27  ;;  %v2863_v36 = vpop.permute.xlu0 %604  ;;  %v510_v51 = vmul.f32 %v488_v49, %v455_v9 }
  0xfc   : > { %540 = vperm.xlu1 %2340, %v511_v33  }
  0xfd   : > { %v496_v52 = vpop.permute.xlu1 %495 }
  0xfe   : > { %1274 = vadd.xlane.f32.xlu0 %v1273_v34  ;;  %v2867_v40 = vpop.permute.xlu0 %618  ;;  %v512_v53 = vmul.f32 %v496_v52, %v457_v45 }
 0x100   : > { %1293 = vbcast.lane.b32.xlu1 %v1287_v37, 264 }
 0x101   : > { %v2881_v56 = vpop.permute.xlu1 %674 }
 0x102   : > { %v2869_v41 = vpop.permute.xlu0 %625 }
 0x104   : > { %1308 = vbcast.lane.b32.xlu1 %v1306_v39, 256 }
 0x105   : > { %v2885_v58 = vpop.permute.xlu1 %716 }
 0x106   : > { %v2871_v42 = vpop.permute.xlu0 %632 }
 0x108   : > { %1297 = vbcast.lane.b32.xlu1 %v1287_v37, 272 }
 0x109   : > { %v2889_v60 = vpop.permute.xlu1 %730 }
 0x10a   : > { %v2873_v47 = vpop.permute.xlu0 %639 }
 0x10c   : > { %1301 = vbcast.lane.b32.xlu1 %v1287_v37, 280 }
 0x10d   : > { %v2893_v62 = vpop.permute.xlu1 %744 }
 0x10e   : > { %v2875_v50 = vpop.permute.xlu0 %646 }
 0x111   : > { %v2897_v0 = vpop.permute.xlu1 %758 }
 0x112   : > { %v2877_v54 = vpop.permute.xlu0 %653 }
 0x114   : > { %522 = vperm.xlu0 %2339, %v505_v46  }
 0x115   : > { %v2901_v2 = vpop.permute.xlu1 %772 }
 0x116   : > { %v2879_v55 = vpop.permute.xlu0 %660 }
 0x118   : > { %531 = vperm.xlu0 %2339, %v508_v48  }
 0x119   : > { %v2905_v4 = vpop.permute.xlu1 %786 }
 0x11a   : > { %v2883_v57 = vpop.permute.xlu0 %667 }
 0x11c   : > { %537 = vperm.xlu0 %2339, %v510_v51  }
 0x11d   : > { %v2909_v6 = vpop.permute.xlu1 %800 }
 0x11e   : > { %v2887_v59 = vpop.permute.xlu0 %681 }
 0x120   : > { %543 = vperm.xlu0 %2339, %v512_v53  }
 0x121   : > { %v2913_v8 = vpop.permute.xlu1 %814 }
 0x122   : > { %v2891_v61 = vpop.permute.xlu0 %688 }
 0x124   : > { %1289 = vbcast.lane.b32.xlu0 %v1287_v37, 256 }
 0x125   : > { %v2917_v10 = vpop.permute.xlu1 %828 }
 0x126   : > { %v2895_v63 = vpop.permute.xlu0 %695 }
 0x128   : > { %1312 = vbcast.lane.b32.xlu0 %v1306_v39, 264 }
 0x12a   : > { %v2899_v1 = vpop.permute.xlu0 %702 }
 0x12c   : > { %1316 = vbcast.lane.b32.xlu0 %v1306_v39, 272 }
 0x12e   : > { %v2903_v3 = vpop.permute.xlu0 %709 }
 0x130   : > { %1320 = vbcast.lane.b32.xlu0 %v1306_v39, 280 }
 0x132   : > { %v2907_v5 = vpop.permute.xlu0 %723 }
 0x136   : > { %v2911_v7 = vpop.permute.xlu0 %737 }
 0x13a   : > { %v2915_v9 = vpop.permute.xlu0 %751 }
 0x13e   : > { %v2919_v11 = vpop.permute.xlu0 %765 }
 0x13f   : > { %3432 = vst [vmem:[#allocation15_spill] sm:$0xff] %v2919_v11 }
 0x142   : > { %v2921_v16 = vpop.permute.xlu0 %779 }
 0x143   : > { %3433 = vst [vmem:[#allocation16_spill] sm:$0xff] %v2921_v16 }
 0x146   : > { %v2923_v19 = vpop.permute.xlu0 %793 }
 0x147   : > { %3434 = vst [vmem:[#allocation17_spill] sm:$0xff] %v2923_v19 }
 0x14a   : > { %v2925_v21 = vpop.permute.xlu0 %807 }
 0x14b   : > { %3435 = vst [vmem:[#allocation18_spill] sm:$0xff] %v2925_v21 }
 0x14e   : > { %v2929_v23 = vpop.permute.xlu0 %821 }
 0x14f   : > { %3436 = vst [vmem:[#allocation19_spill] sm:$0xff] %v2929_v23 }
 0x152   : > { %v2931_v26 = vpop.permute.xlu0 %835 }
 0x153   : > { %3437 = vst [vmem:[#allocation20_spill] sm:$0xff] %v2931_v26 }
 0x156   : > { %v1269_v15 = vpop.xlane.xlu1 %1268 }
 0x157   : > { %v1279_v48 = vmul.f32 0.00390625, %v1269_v15 }
 0x15a   : > { %v1278_v17 = vpop.xlane.xlu1 %1277 }
 0x16b   : > { %v526_v20 = vpop.permute.xlu1 %525 }
 0x16f   : > { %v2927_v22 = vpop.permute.xlu1 %528 }
 0x173   : > { %v535_v25 = vpop.permute.xlu1 %534 }
 0x177   : > { %v541_v27 = vpop.permute.xlu1 %540 }
 0x17b   : > { %v1294_v31 = vpop.permute.xlu1 %1293 }
 0x17f   : > { %v1309_v46 = vpop.permute.xlu1 %1308 }
 0x180   : > { %v1334_v12 = vmul.f32 %v1309_v46, %v1279_v48  ;;  %v2269_v46 = vld [vmem:[%s3401_s7] ss:$0 sm:$0xff] }
 0x183   : > { %v1272_v28 = vpop.xlane.xlu0 %1271  ;;  %v1298_v52 = vpop.permute.xlu1 %1297 }
 0x184   : > { %v1280_v30 = vmul.f32 0.00390625, %v1272_v28 }
 0x186   : > { %v1331_v33 = vmul.f32 %v1294_v31, %v1280_v30  ;;  %v1282_v31 = vmul.f32 0.00390625, %v1278_v17 }
 0x187   : > { %v1275_v34 = vpop.xlane.xlu0 %1274  ;;  %v1302_v19 = vpop.permute.xlu1 %1301 }
 0x188   : > { %1350 = vperm.xlu1 %2340, %v1331_v33   ;;  %v1281_v26 = vmul.f32 0.00390625, %v1275_v34  ;;  %v1333_v11 = vmul.f32 %v1302_v19, %v1282_v31 }
 0x18a   : > { %v1332_v33 = vmul.f32 %v1298_v52, %v1281_v26 }
 0x18f   : > { %v523_v37 = vpop.permute.xlu0 %522 }
 0x193   : > { %v532_v39 = vpop.permute.xlu0 %531 }
 0x197   : > { %v538_v43 = vpop.permute.xlu0 %537 }
 0x19b   : > { %v544_v45 = vpop.permute.xlu0 %543 }
 0x19f   : > { %v1290_v49 = vpop.permute.xlu0 %1289 }
 0x1a0   : > { %v1330_v51 = vmul.f32 %v1290_v49, %v1279_v48 }
 0x1a2   : > { %1347 = vperm.xlu0 %2339, %v1330_v51  }
 0x1a3   : > { %v1313_v53 = vpop.permute.xlu0 %1312 }
 0x1a4   : > { %v1335_v23 = vmul.f32 %v1313_v53, %v1280_v30  ;;  %v3438_v30 = vlaneseq }
 0x1a6   : > { %1359 = vperm.xlu0 %2339, %v1334_v12   ;;  %1362 = vperm.xlu1 %2340, %v1335_v23   ;;  %v546_v12 = vand.u32 127, %v3438_v30  ;;  %v1264_v30 = vld [vmem:[%s3402_s8 + $0x10] sm:$0xff] }
 0x1a7   : > { %v1317_v28 = vpop.permute.xlu0 %1316 }
 0x1a8   : > { %v1336_v21 = vmul.f32 %v1317_v28, %v1281_v26  ;;  %v551_v23 = vadd.s32 4294967288, %v546_v12  ;;  %v558_v34 = vadd.s32 4294967280, %v546_v12  ;;  %v2938_v17 = vsub.s32 %v546_v12, %v2764_v13 }
 0x1aa   : > { %1353 = vperm.xlu0 %2339, %v1332_v33   ;;  %1365 = vperm.xlu1 %2340, %v1336_v21   ;;  %v2941_v26 = vsub.s32 %v551_v23, %v2764_v13  ;;  %v565_v21 = vadd.s32 4294967272, %v546_v12  ;;  %v575_v19 = vrot.slane %v535_v25, %v2938_v17  ;;  %v550_v48 = vrot.slane %v523_v37, %v2938_v17  ;;  %v2984_v23 = vld [vmem:[%s3402_s8 + $0x18] sm:$0xff] }
 0x1ab   : > { %v1321_v16 = vpop.permute.xlu0 %1320  ;;  %v1543_v12 = vrot.slane %v1264_v30, %v2767_v14 }
 0x1ac   : > { %v1337_v15 = vmul.f32 %v1321_v16, %v1282_v31  ;;  %v579_v16 = vrot.slane %v538_v43, %v2941_v26  ;;  %v2950_v49 = vsub.s32 %v565_v21, %v2764_v13  ;;  %v555_v51 = vrot.slane %v526_v20, %v2941_v26 }
 0x1ae   : > { %1356 = vperm.xlu0 %2339, %v1333_v11   ;;  %1368 = vperm.xlu1 %2340, %v1337_v15   ;;  %v2945_v11 = vsub.s32 %v558_v34, %v2764_v13  ;;  %v580_v52 = vsel %vm556_vm0, %v579_v16, %v575_v19  ;;  %v589_v53 = vrot.slane %v544_v45, %v2950_v49  ;;  %v2973_v15 = vld [vmem:[%s3402_s8 + $0x8] sm:$0xff] }
 0x1af   : > { %v557_v43 = vsel %vm556_vm0, %v555_v51, %v550_v48  ;;  %v569_v31 = vrot.slane %v532_v39, %v2950_v49  ;;  %v1599_v34 = vrot.slane %v2984_v23, %v2767_v14  ;;  %v1557_v16 = vrot.slane %v1264_v30, %v2799_v29 }
 0x1b0   : > { %v584_v28 = vrot.slane %v541_v27, %v2945_v11  ;;  %v562_v25 = vrot.slane %v2927_v22, %v2945_v11  ;;  %v1262_v22 = vld [vmem:[%s3402_s8] sm:$0xff]  ;;  %v1564_v48 = vrot.slane %v1264_v30, %v2805_v32 }
 0x1b1   : > { %v1438_v39 = vrot.slane %v1262_v22, %v2774_v18  ;;  %v1445_v21 = vrot.slane %v1262_v22, %v2799_v29  ;;  %v1452_v19 = vrot.slane %v1262_v22, %v2805_v32  ;;  %v1459_v51 = vrot.slane %v1262_v22, %v2811_v35 }
 0x1b2   : > { %1419 = vbcast.lane.b32.xlu1 %v2269_v46, 256  ;;  %v585_v13 = vsel %vm563_vm1, %v584_v28, %v580_v52  ;;  %v564_v20 = vsel %vm563_vm1, %v562_v25, %v557_v43  ;;  %v1487_v46 = vrot.slane %v2973_v15, %v2767_v14  ;;  %v1571_v52 = vrot.slane %v1264_v30, %v2811_v35 }
 0x1b3   : > { %v590_v37 = vsel %vm570_vm2, %v589_v53, %v585_v13  ;;  %v571_v45 = vsel %vm570_vm2, %v569_v31, %v564_v20  ;;  %v1466_v53 = vrot.slane %v1262_v22, %v2817_v38  ;;  %v1578_v28 = vrot.slane %v1264_v30, %v2817_v38 }
 0x1b4   : > { %v592_v27 = vsel %vm591_vm3, %v590_v37, %v571_v45  ;;  %v1473_v43 = vrot.slane %v1262_v22, %v2788_v24  ;;  %v1585_v31 = vrot.slane %v1264_v30, %v2788_v24  ;;  %v1480_v25 = vrot.slane %v1262_v22, %v2828_v44 }
 0x1b5   : > { %v595_v33 = vsel %vm594_vm4, %v592_v27, 0.0  ;;  %v1592_v20 = vrot.slane %v1264_v30, %v2828_v44 }
 0x1d6   : > { %596 = vadd.xlane.f32.xlu1 %v595_v33 }
 0x1e7   : > { %1440 = vbcast.lane.b32.xlu1 %v1438_v39, 256 }
 0x1eb   : > { %1489 = vbcast.lane.b32.xlu1 %v1487_v46, 256 }
 0x1ef   : > { %1545 = vbcast.lane.b32.xlu1 %v1543_v12, 256 }
 0x1f3   : > { %1601 = vbcast.lane.b32.xlu1 %v1599_v34, 256 }
 0x1f7   : > { %1447 = vbcast.lane.b32.xlu1 %v1445_v21, 256 }
 0x1fb   : > { %1559 = vbcast.lane.b32.xlu1 %v1557_v16, 256 }
 0x1ff   : > { %1454 = vbcast.lane.b32.xlu1 %v1452_v19, 256 }
 0x203   : > { %1566 = vbcast.lane.b32.xlu1 %v1564_v48, 256  ;;  %v1351_v13 = vpop.permute.xlu1 %1350 }
 0x204   : > { %v1377_v19 = vrot.slane %v1351_v13, %v2941_v26 }
 0x207   : > { %1461 = vbcast.lane.b32.xlu1 %v1459_v51, 256 }
 0x20b   : > { %1573 = vbcast.lane.b32.xlu1 %v1571_v52, 256 }
 0x20f   : > { %1468 = vbcast.lane.b32.xlu1 %v1466_v53, 256 }
 0x213   : > { %1580 = vbcast.lane.b32.xlu1 %v1578_v28, 256 }
 0x217   : > { %1475 = vbcast.lane.b32.xlu1 %v1473_v43, 256 }
 0x21b   : > { %1587 = vbcast.lane.b32.xlu1 %v1585_v31, 256 }
 0x21d   : > { %v1348_v37 = vpop.permute.xlu0 %1347 }
 0x21e   : > { %v1373_v46 = vrot.slane %v1348_v37, %v2938_v17 }
 0x21f   : > { %1482 = vbcast.lane.b32.xlu1 %v1480_v25, 256 }
 0x220   : > { %v1378_v52 = vsel %vm556_vm0, %v1377_v19, %v1373_v46 }
 0x221   : > { %v1363_v45 = vpop.permute.xlu1 %1362  ;;  %v1360_v27 = vpop.permute.xlu0 %1359 }
 0x222   : > { %v1396_v12 = vrot.slane %v1363_v45, %v2941_v26  ;;  %v1392_v34 = vrot.slane %v1360_v27, %v2938_v17  ;;  %v1494_v45 = vrot.slane %v2973_v15, %v2774_v18  ;;  %v1606_v27 = vrot.slane %v2984_v23, %v2774_v18 }
 0x223   : > { %1594 = vbcast.lane.b32.xlu1 %v1592_v20, 256  ;;  %v1431_v20 = vrot.slane %v1262_v22, %v2767_v14  ;;  %v1508_v14 = vrot.slane %v2973_v15, %v2805_v32 }
 0x224   : > { %v1397_v53 = vsel %vm556_vm0, %v1396_v12, %v1392_v34  ;;  %v1515_v12 = vrot.slane %v2973_v15, %v2811_v35 }
 0x225   : > { %v1366_v33 = vpop.permute.xlu1 %1365  ;;  %v1354_v39 = vpop.permute.xlu0 %1353 }
 0x226   : > { %v1401_v21 = vrot.slane %v1366_v33, %v2945_v11  ;;  %v1382_v16 = vrot.slane %v1354_v39, %v2945_v11  ;;  %v1501_v33 = vrot.slane %v2973_v15, %v2799_v29  ;;  %v1613_v39 = vrot.slane %v2984_v23, %v2799_v29 }
 0x228   : > { %v1383_v31 = vsel %vm563_vm1, %v1382_v16, %v1378_v52  ;;  %v1402_v25 = vsel %vm563_vm1, %v1401_v21, %v1397_v53  ;;  %v1627_v21 = vrot.slane %v2984_v23, %v2811_v35 }
 0x229   : > { %v1369_v48 = vpop.permute.xlu1 %1368  ;;  %v1357_v51 = vpop.permute.xlu0 %1356 }
 0x22a   : > { %v1406_v28 = vrot.slane %v1369_v48, %v2950_v49  ;;  %v1387_v43 = vrot.slane %v1357_v51, %v2950_v49  ;;  %v1550_v49 = vrot.slane %v1264_v30, %v2774_v18  ;;  %v1620_v30 = vrot.slane %v2984_v23, %v2805_v32 }
 0x22c   : > { %v1388_v37 = vsel %vm570_vm2, %v1387_v43, %v1383_v31  ;;  %v1407_v11 = vsel %vm570_vm2, %v1406_v28, %v1402_v25 }
 0x22d   : > { %v1408_v26 = vsel %vm591_vm3, %v1407_v11, %v1388_v37  ;;  %v3028_v22 = vpop.permute.xlu1 %1419  ;;  %v3441_v11 = vld [vmem:[#allocation17_spill] sm:$0xff] }
 0x22e   : > { %v1410_v13 = vsel %vm594_vm4, %v1408_v26, 0.0 }
 0x22f   : > { %1411 = vadd.xlane.f32.xlu0 %v1410_v13 }
 0x245   : > { %1433 = vbcast.lane.b32.xlu0 %v1431_v20, 256 }
 0x249   : > { %1496 = vbcast.lane.b32.xlu0 %v1494_v45, 256 }
 0x24d   : > { %1552 = vbcast.lane.b32.xlu0 %v1550_v49, 256 }
 0x251   : > { %1608 = vbcast.lane.b32.xlu0 %v1606_v27, 256  ;;  %v3443_v27 = vld [vmem:[#allocation19_spill] sm:$0xff] }
 0x255   : > { %1503 = vbcast.lane.b32.xlu0 %v1501_v33, 256 }
 0x259   : > { %1615 = vbcast.lane.b32.xlu0 %v1613_v39, 256 }
 0x25d   : > { %1510 = vbcast.lane.b32.xlu0 %v1508_v14, 256 }
 0x25f   : > { %v597_v46 = vpop.xlane.xlu1 %596 }
 0x260   : > { %v607_v18 = vadd.f32 %v2863_v36, %v597_v46  ;;  %v1522_v36 = vrot.slane %v2973_v15, %v2817_v38 }
 0x261   : > { %1622 = vbcast.lane.b32.xlu0 %v1620_v30, 256  ;;  %v3444_v30 = vld [vmem:[#allocation20_spill] sm:$0xff] }
 0x262   : > { %v3035_v34 = vmax.f32 %v607_v18, 0.0 }
 0x263   : > { %v3069_v51 = vpop.permute.xlu1 %1440 }
 0x264   : > { %v869_v29 = vmul.f32 %v2867_v40, %v3035_v34  ;;  %v871_v32 = vmul.f32 %v2871_v42, %v3035_v34  ;;  %v873_v16 = vmul.f32 %v2875_v50, %v3035_v34  ;;  %v1634_v40 = vrot.slane %v2984_v23, %v2817_v38 }
 0x265   : > { %1517 = vbcast.lane.b32.xlu0 %v1515_v12, 256  ;;  %v875_v35 = vmul.f32 %v2879_v55, %v3035_v34  ;;  %v1529_v42 = vrot.slane %v2973_v15, %v2788_v24  ;;  %v877_v19 = vmul.f32 %v2881_v56, %v3035_v34  ;;  %v1641_v50 = vrot.slane %v2984_v23, %v2788_v24 }
 0x266   : > { %934 = vperm.xlu1 %2340, %v869_v29   ;;  %v879_v38 = vmul.f32 %v2891_v61, %v3035_v34  ;;  %v1536_v55 = vrot.slane %v2973_v15, %v2828_v44  ;;  %v881_v48 = vmul.f32 %v2899_v1, %v3035_v34  ;;  %v1648_v56 = vrot.slane %v2984_v23, %v2828_v44 }
 0x267   : > { %v883_v24 = vmul.f32 %v2885_v58, %v3035_v34  ;;  %v870_v61 = vmul.f32 %v2869_v41, %v3035_v34  ;;  %v885_v15 = vmul.f32 %v2889_v60, %v3035_v34  ;;  %v872_v1 = vmul.f32 %v2873_v47, %v3035_v34  ;;  %v1490_v23 = vpop.permute.xlu1 %1489 }
 0x268   : > { %v887_v44 = vmul.f32 %v2893_v62, %v3035_v34  ;;  %v874_v58 = vmul.f32 %v2877_v54, %v3035_v34  ;;  %v889_v41 = vmul.f32 %v2897_v0, %v3035_v34  ;;  %v876_v60 = vmul.f32 %v2883_v57, %v3035_v34 }
 0x269   : > { %1629 = vbcast.lane.b32.xlu0 %v1627_v21, 256  ;;  %v891_v47 = vmul.f32 %v2901_v2, %v3035_v34  ;;  %v878_v62 = vmul.f32 %v2887_v59, %v3035_v34  ;;  %v893_v54 = vmul.f32 %v2905_v4, %v3035_v34  ;;  %v880_v0 = vmul.f32 %v2895_v63, %v3035_v34 }
 0x26a   : > { %940 = vperm.xlu1 %2340, %v871_v32   ;;  %v895_v57 = vmul.f32 %v2909_v6, %v3035_v34  ;;  %v882_v2 = vmul.f32 %v2903_v3, %v3035_v34  ;;  %v897_v59 = vmul.f32 %v2913_v8, %v3035_v34  ;;  %v884_v4 = vmul.f32 %v2907_v5, %v3035_v34  ;;  %v3439_v8 = vld [vmem:[#allocation15_spill] sm:$0xff]  ;;  %v3440_v5 = vld [vmem:[#allocation16_spill] sm:$0xff] }
 0x26b   : > { %v1546_v52 = vpop.permute.xlu1 %1545  ;;  %v899_v63 = vmul.f32 %v2917_v10, %v3035_v34  ;;  %v886_v6 = vmul.f32 %v2911_v7, %v3035_v34  ;;  %v888_v3 = vmul.f32 %v2915_v9, %v3035_v34  ;;  %v890_v25 = vmul.f32 %v3439_v8, %v3035_v34  ;;  %v3442_v7 = vld [vmem:[#allocation18_spill] sm:$0xff] }
 0x26c   : > { %v892_v10 = vmul.f32 %v3440_v5, %v3035_v34  ;;  %v894_v26 = vmul.f32 %v3441_v11, %v3035_v34  ;;  %v896_v20 = vmul.f32 %v3442_v7, %v3035_v34  ;;  %v898_v33 = vmul.f32 %v3443_v27, %v3035_v34 }
 0x26d   : > { %1524 = vbcast.lane.b32.xlu0 %v1522_v36, 256  ;;  %v900_v46 = vmul.f32 %v3444_v30, %v3035_v34 }
 0x26e   : > { %946 = vperm.xlu1 %2340, %v873_v16  }
 0x26f   : > { %v1602_v53 = vpop.permute.xlu1 %1601 }
 0x271   : > { %1636 = vbcast.lane.b32.xlu0 %v1634_v40, 256 }
 0x272   : > { %952 = vperm.xlu1 %2340, %v875_v35  }
 0x273   : > { %v1448_v28 = vpop.permute.xlu1 %1447 }
 0x275   : > { %1531 = vbcast.lane.b32.xlu0 %v1529_v42, 256 }
 0x276   : > { %958 = vperm.xlu1 %2340, %v877_v19  }
 0x277   : > { %v1560_v43 = vpop.permute.xlu1 %1559 }
 0x279   : > { %1643 = vbcast.lane.b32.xlu0 %v1641_v50, 256 }
 0x27a   : > { %964 = vperm.xlu1 %2340, %v879_v38  }
 0x27b   : > { %v1455_v31 = vpop.permute.xlu1 %1454 }
 0x27d   : > { %1538 = vbcast.lane.b32.xlu0 %v1536_v55, 256 }
 0x27e   : > { %970 = vperm.xlu1 %2340, %v881_v48  }
 0x27f   : > { %v1567_v37 = vpop.permute.xlu1 %1566 }
 0x281   : > { %1650 = vbcast.lane.b32.xlu0 %v1648_v56, 256 }
 0x282   : > { %976 = vperm.xlu1 %2340, %v883_v24  }
 0x283   : > { %v1462_v13 = vpop.permute.xlu1 %1461 }
 0x285   : > { %937 = vperm.xlu0 %2339, %v870_v61  }
 0x286   : > { %982 = vperm.xlu1 %2340, %v885_v15  }
 0x287   : > { %v1574_v45 = vpop.permute.xlu1 %1573 }
 0x289   : > { %943 = vperm.xlu0 %2339, %v872_v1  }
 0x28a   : > { %988 = vperm.xlu1 %2340, %v887_v44  }
 0x28b   : > { %v1469_v18 = vpop.permute.xlu1 %1468 }
 0x28d   : > { %949 = vperm.xlu0 %2339, %v874_v58  }
 0x28e   : > { %994 = vperm.xlu1 %2340, %v889_v41  }
 0x28f   : > { %v1581_v32 = vpop.permute.xlu1 %1580 }
 0x291   : > { %955 = vperm.xlu0 %2339, %v876_v60  }
 0x292   : > { %1000 = vperm.xlu1 %2340, %v891_v47  }
 0x293   : > { %v1476_v35 = vpop.permute.xlu1 %1475 }
 0x295   : > { %961 = vperm.xlu0 %2339, %v878_v62  }
 0x296   : > { %1006 = vperm.xlu1 %2340, %v893_v54  }
 0x297   : > { %v1588_v48 = vpop.permute.xlu1 %1587 }
 0x299   : > { %967 = vperm.xlu0 %2339, %v880_v0  }
 0x29a   : > { %1012 = vperm.xlu1 %2340, %v895_v57  }
 0x29b   : > { %v1483_v15 = vpop.permute.xlu1 %1482 }
 0x29d   : > { %973 = vperm.xlu0 %2339, %v882_v2  }
 0x29e   : > { %1018 = vperm.xlu1 %2340, %v897_v59  }
 0x2a1   : > { %979 = vperm.xlu0 %2339, %v884_v4  }
 0x2a2   : > { %1024 = vperm.xlu1 %2340, %v899_v63  }
 0x2a5   : > { %985 = vperm.xlu0 %2339, %v886_v6  }
 0x2a9   : > { %991 = vperm.xlu0 %2339, %v888_v3  }
 0x2ad   : > { %997 = vperm.xlu0 %2339, %v890_v25  }
 0x2b1   : > { %1003 = vperm.xlu0 %2339, %v892_v10  }
 0x2b5   : > { %1009 = vperm.xlu0 %2339, %v894_v26  }
 0x2b8   : > { %v1412_v9 = vpop.xlane.xlu0 %1411 }
 0x2b9   : > { %v1422_v49 = vadd.f32 %v3028_v22, %v1412_v9  ;;  %1015 = vperm.xlu0 %2339, %v896_v20  }
 0x2bb   : > { %v3116_v14 = vmax.f32 %v1422_v49, 0.0 }
 0x2bc   : > { %v1434_v39 = vpop.permute.xlu0 %1433 }
 0x2bd   : > { %1021 = vperm.xlu0 %2339, %v898_v33   ;;  %v1684_v29 = vmul.f32 %v1434_v39, %v3116_v14  ;;  %v1685_v21 = vmul.f32 %v3069_v51, %v3116_v14  ;;  %v1692_v36 = vmul.f32 %v1490_v23, %v3116_v14  ;;  %v1700_v34 = vmul.f32 %v1546_v52, %v3116_v14  ;;  %v1595_v52 = vpop.permute.xlu1 %1594  ;;  %v2264_v39 = vld [vmem:[%s3399_s5] ss:$0 sm:$0xff] }
 0x2be   : > { %v1708_v50 = vmul.f32 %v1602_v53, %v3116_v14  ;;  %v1686_v56 = vmul.f32 %v1448_v28, %v3116_v14  ;;  %v1702_v51 = vmul.f32 %v1560_v43, %v3116_v14  ;;  %v1687_v23 = vmul.f32 %v1455_v31, %v3116_v14 }
 0x2bf   : > { %1749 = vperm.xlu1 %2340, %v1684_v29   ;;  %v1703_v60 = vmul.f32 %v1567_v37, %v3116_v14  ;;  %v1688_v54 = vmul.f32 %v1462_v13, %v3116_v14  ;;  %v1704_v2 = vmul.f32 %v1574_v45, %v3116_v14  ;;  %v1689_v63 = vmul.f32 %v1469_v18, %v3116_v14 }
 0x2c0   : > { %v1497_v12 = vpop.permute.xlu0 %1496  ;;  %v1705_v31 = vmul.f32 %v1581_v32, %v3116_v14  ;;  %v1690_v37 = vmul.f32 %v1476_v35, %v3116_v14  ;;  %v1706_v11 = vmul.f32 %v1588_v48, %v3116_v14  ;;  %v1691_v20 = vmul.f32 %v1483_v15, %v3116_v14 }
 0x2c1   : > { %1027 = vperm.xlu0 %2339, %v900_v46   ;;  %v1693_v16 = vmul.f32 %v1497_v12, %v3116_v14  ;;  %v1707_v49 = vmul.f32 %v1595_v52, %v3116_v14  ;;  %v3167_v12 = vld [vmem:[%s3403_s9] ss:$0 sm:$0xff] }
 0x2c3   : > { %1773 = vperm.xlu1 %2340, %v1692_v36  }
 0x2c4   : > { %v1553_v22 = vpop.permute.xlu0 %1552 }
 0x2c5   : > { %1752 = vperm.xlu0 %2339, %v1685_v21   ;;  %v1701_v42 = vmul.f32 %v1553_v22, %v3116_v14 }
 0x2c7   : > { %1797 = vperm.xlu1 %2340, %v1700_v34  }
 0x2c8   : > { %v1609_v40 = vpop.permute.xlu0 %1608 }
 0x2c9   : > { %1776 = vperm.xlu0 %2339, %v1693_v16   ;;  %v1709_v38 = vmul.f32 %v1609_v40, %v3116_v14 }
 0x2cb   : > { %1821 = vperm.xlu1 %2340, %v1708_v50  }
 0x2cc   : > { %v1504_v19 = vpop.permute.xlu0 %1503 }
 0x2cd   : > { %1800 = vperm.xlu0 %2339, %v1701_v42   ;;  %v1694_v24 = vmul.f32 %v1504_v19, %v3116_v14 }
 0x2cf   : > { %1755 = vperm.xlu1 %2340, %v1686_v56  }
 0x2d0   : > { %v1616_v55 = vpop.permute.xlu0 %1615 }
 0x2d1   : > { %1824 = vperm.xlu0 %2339, %v1709_v38   ;;  %v1710_v1 = vmul.f32 %v1616_v55, %v3116_v14 }
 0x2d3   : > { %1803 = vperm.xlu1 %2340, %v1702_v51  }
 0x2d4   : > { %v1511_v61 = vpop.permute.xlu0 %1510 }
 0x2d5   : > { %1779 = vperm.xlu0 %2339, %v1694_v24   ;;  %v1695_v58 = vmul.f32 %v1511_v61, %v3116_v14 }
 0x2d7   : > { %1758 = vperm.xlu1 %2340, %v1687_v23  }
 0x2d8   : > { %v1623_v44 = vpop.permute.xlu0 %1622 }
 0x2d9   : > { %1827 = vperm.xlu0 %2339, %v1710_v1   ;;  %v1711_v47 = vmul.f32 %v1623_v44, %v3116_v14 }
 0x2db   : > { %1806 = vperm.xlu1 %2340, %v1703_v60  }
 0x2dc   : > { %v1518_v41 = vpop.permute.xlu0 %1517 }
 0x2dd   : > { %1782 = vperm.xlu0 %2339, %v1695_v58   ;;  %v1696_v0 = vmul.f32 %v1518_v41, %v3116_v14 }
 0x2df   : > { %1761 = vperm.xlu1 %2340, %v1688_v54  }
 0x2e0   : > { %v1630_v62 = vpop.permute.xlu0 %1629 }
 0x2e1   : > { %v3138_v53 = vpop.permute.xlu1 %934  ;;  %1830 = vperm.xlu0 %2339, %v1711_v47   ;;  %v1712_v59 = vmul.f32 %v1630_v62, %v3116_v14 }
 0x2e2   : > { %v1032_v48 = vrot.slane %v3138_v53, %v2938_v17 }
 0x2e3   : > { %1809 = vperm.xlu1 %2340, %v1704_v2  }
 0x2e4   : > { %v1525_v57 = vpop.permute.xlu0 %1524 }
 0x2e5   : > { %v3142_v28 = vpop.permute.xlu1 %940  ;;  %1785 = vperm.xlu0 %2339, %v1696_v0   ;;  %v1697_v43 = vmul.f32 %v1525_v57, %v3116_v14 }
 0x2e6   : > { %v1040_v15 = vrot.slane %v3142_v28, %v2938_v17 }
 0x2e7   : > { %1764 = vperm.xlu1 %2340, %v1689_v63  }
 0x2e8   : > { %v1637_v4 = vpop.permute.xlu0 %1636 }
 0x2e9   : > { %1833 = vperm.xlu0 %2339, %v1712_v59   ;;  %v3147_v6 = vpop.permute.xlu1 %946  ;;  %v1713_v8 = vmul.f32 %v1637_v4, %v3116_v14 }
 0x2ea   : > { %v1048_v57 = vrot.slane %v3147_v6, %v2938_v17 }
 0x2eb   : > { %1812 = vperm.xlu1 %2340, %v1705_v31  }
 0x2ec   : > { %v1532_v3 = vpop.permute.xlu0 %1531 }
 0x2ed   : > { %1788 = vperm.xlu0 %2339, %v1697_v43   ;;  %v3152_v5 = vpop.permute.xlu1 %952  ;;  %v1698_v10 = vmul.f32 %v1532_v3, %v3116_v14 }
 0x2ef   : > { %1767 = vperm.xlu1 %2340, %v1690_v37  }
 0x2f0   : > { %v1644_v25 = vpop.permute.xlu0 %1643 }
 0x2f1   : > { %1836 = vperm.xlu0 %2339, %v1713_v8   ;;  %v1714_v13 = vmul.f32 %v1644_v25, %v3116_v14  ;;  %v959_v7 = vpop.permute.xlu1 %958 }
 0x2f2   : > { %v1064_v35 = vrot.slane %v959_v7, %v2938_v17 }
 0x2f3   : > { %1815 = vperm.xlu1 %2340, %v1706_v11   ;;  %v1056_v11 = vrot.slane %v3152_v5, %v2938_v17 }
 0x2f4   : > { %v1539_v26 = vpop.permute.xlu0 %1538 }
 0x2f5   : > { %1791 = vperm.xlu0 %2339, %v1698_v10   ;;  %v1699_v9 = vmul.f32 %v1539_v26, %v3116_v14  ;;  %v965_v27 = vpop.permute.xlu1 %964 }
 0x2f6   : > { %v1072_v56 = vrot.slane %v965_v27, %v2938_v17 }
 0x2f7   : > { %1770 = vperm.xlu1 %2340, %v1691_v20  }
 0x2f8   : > { %v1651_v45 = vpop.permute.xlu0 %1650 }
 0x2f9   : > { %1839 = vperm.xlu0 %2339, %v1714_v13   ;;  %v1715_v33 = vmul.f32 %v1651_v45, %v3116_v14  ;;  %v971_v46 = vpop.permute.xlu1 %970 }
 0x2fa   : > { %v1080_v58 = vrot.slane %v971_v46, %v2938_v17 }
 0x2fb   : > { %1818 = vperm.xlu1 %2340, %v1707_v49  }
 0x2fd   : > { %1794 = vperm.xlu0 %2339, %v1699_v9   ;;  %v977_v21 = vpop.permute.xlu1 %976 }
 0x2fe   : > { %v1088_v63 = vrot.slane %v977_v21, %v2938_v17 }
 0x2ff   : > { %1218 = vbcast.lane.b32.xlu1 %v2264_v39, 264 }
 0x300   : > { %v938_v30 = vpop.permute.xlu0 %937 }
 0x301   : > { %1842 = vperm.xlu0 %2339, %v1715_v33   ;;  %v983_v22 = vpop.permute.xlu1 %982  ;;  %v1036_v42 = vrot.slane %v938_v30, %v2938_v17 }
 0x302   : > { %v1096_v41 = vrot.slane %v983_v22, %v2938_v17 }
 0x303   : > { %1222 = vbcast.lane.b32.xlu1 %v2264_v39, 272  ;;  %v1157_v24 = vsel %vm591_vm3, %v1036_v42, %v1032_v48 }
 0x304   : > { %v944_v18 = vpop.permute.xlu0 %943  ;;  %v1159_v47 = vsel %vm1158_vm5, %v1040_v15, %v1157_v24 }
 0x305   : > { %1214 = vbcast.lane.b32.xlu0 %v2264_v39, 256  ;;  %v989_v16 = vpop.permute.xlu1 %988  ;;  %v1044_v61 = vrot.slane %v944_v18, %v2938_v17 }
 0x306   : > { %v1104_v2 = vrot.slane %v989_v16, %v2938_v17 }
 0x307   : > { %2022 = vbcast.lane.b32.xlu1 %v3167_v12, 256  ;;  %v1161_v62 = vsel %vm1160_vm6, %v1044_v61, %v1159_v47 }
 0x308   : > { %v950_v29 = vpop.permute.xlu0 %949  ;;  %v1163_v3 = vsel %vm1162_vm7, %v1048_v57, %v1161_v62 }
 0x309   : > { %1226 = vbcast.lane.b32.xlu0 %v2264_v39, 280  ;;  %v995_v19 = vpop.permute.xlu1 %994  ;;  %v1052_v54 = vrot.slane %v950_v29, %v2938_v17 }
 0x30a   : > { %v1112_v26 = vrot.slane %v995_v19, %v2938_v17 }
 0x30b   : > { %v1165_v8 = vsel %vm1164_vm8, %v1052_v54, %v1163_v3 }
 0x30c   : > { %v3170_v14 = vpop.permute.xlu0 %955  ;;  %v1167_v45 = vsel %vm1166_vm9, %v1056_v11, %v1165_v8 }
 0x30d   : > { %2026 = vbcast.lane.b32.xlu0 %v3167_v12, 264  ;;  %v1001_v60 = vpop.permute.xlu1 %1000  ;;  %v1060_v6 = vrot.slane %v3170_v14, %v2938_v17 }
 0x30e   : > { %v1120_v5 = vrot.slane %v1001_v60, %v2938_v17 }
 0x30f   : > { %v1169_v27 = vsel %vm1168_vm10, %v1060_v6, %v1167_v45 }
 0x310   : > { %v962_v32 = vpop.permute.xlu0 %961  ;;  %v1196_v18 = vsel %vm1195_vm11, %v1169_v27, 0.0 }
 0x311   : > { %v1068_v40 = vrot.slane %v962_v32, %v2938_v17  ;;  %v1007_v25 = vpop.permute.xlu1 %1006 }
 0x312   : > { %v1128_v32 = vrot.slane %v1007_v25, %v2938_v17 }
 0x313   : > { %v1170_v50 = vsel %vm591_vm3, %v1068_v40, %v1064_v35 }
 0x314   : > { %v968_v36 = vpop.permute.xlu0 %967  ;;  %v1171_v51 = vsel %vm1158_vm5, %v1072_v56, %v1170_v50 }
 0x315   : > { %v1076_v38 = vrot.slane %v968_v36, %v2938_v17  ;;  %v1013_v30 = vpop.permute.xlu1 %1012 }
 0x317   : > { %v1172_v1 = vsel %vm1160_vm6, %v1076_v38, %v1171_v51 }
 0x318   : > { %v974_v34 = vpop.permute.xlu0 %973  ;;  %v1173_v53 = vsel %vm1162_vm7, %v1080_v58, %v1172_v1 }
 0x319   : > { %v1084_v44 = vrot.slane %v974_v34, %v2938_v17  ;;  %v1019_v16 = vpop.permute.xlu1 %1018  ;;  %v1136_v34 = vrot.slane %v1013_v30, %v2938_v17 }
 0x31a   : > { %v1144_v38 = vrot.slane %v1019_v16, %v2938_v17 }
 0x31b   : > { %v1174_v28 = vsel %vm1164_vm8, %v1084_v44, %v1173_v53 }
 0x31c   : > { %v980_v55 = vpop.permute.xlu0 %979  ;;  %v1175_v10 = vsel %vm1166_vm9, %v1088_v63, %v1174_v28 }
 0x31d   : > { %v1092_v59 = vrot.slane %v980_v55, %v2938_v17  ;;  %v1025_v48 = vpop.permute.xlu1 %1024 }
 0x31e   : > { %v1152_v51 = vrot.slane %v1025_v48, %v2938_v17 }
 0x31f   : > { %v1176_v7 = vsel %vm1168_vm10, %v1092_v59, %v1175_v10 }
 0x320   : > { %v986_v23 = vpop.permute.xlu0 %985  ;;  %v1199_v33 = vsel %vm1195_vm11, %v1176_v7, 0.0 }
 0x321   : > { %v1100_v52 = vrot.slane %v986_v23, %v2938_v17 }
 0x323   : > { %v1177_v0 = vsel %vm591_vm3, %v1100_v52, %v1096_v41 }
 0x324   : > { %v992_v4 = vpop.permute.xlu0 %991  ;;  %v1178_v31 = vsel %vm1158_vm5, %v1104_v2, %v1177_v0 }
 0x325   : > { %v1108_v43 = vrot.slane %v992_v4, %v2938_v17 }
 0x327   : > { %v1179_v37 = vsel %vm1160_vm6, %v1108_v43, %v1178_v31 }
 0x328   : > { %v998_v13 = vpop.permute.xlu0 %997  ;;  %v1180_v9 = vsel %vm1162_vm7, %v1112_v26, %v1179_v37 }
 0x329   : > { %v1116_v20 = vrot.slane %v998_v13, %v2938_v17 }
 0x32b   : > { %v1181_v49 = vsel %vm1164_vm8, %v1116_v20, %v1180_v9  ;;  %1197 = vadd.xlane.f32.xlu1 %v1196_v18 }
 0x32c   : > { %1200 = vadd.xlane.f32.xlu0 %v1199_v33  ;;  %v1004_v39 = vpop.permute.xlu0 %1003  ;;  %v1182_v29 = vsel %vm1166_vm9, %v1120_v5, %v1181_v49 }
 0x32d   : > { %v1124_v46 = vrot.slane %v1004_v39, %v2938_v17 }
 0x32f   : > { %v1183_v21 = vsel %vm1168_vm10, %v1124_v46, %v1182_v29 }
 0x330   : > { %v1010_v14 = vpop.permute.xlu0 %1009  ;;  %v1202_v22 = vsel %vm1195_vm11, %v1183_v21, 0.0 }
 0x331   : > { %v1132_v36 = vrot.slane %v1010_v14, %v2938_v17  ;;  %1203 = vadd.xlane.f32.xlu1 %v1202_v22 }
 0x333   : > { %v1184_v40 = vsel %vm591_vm3, %v1132_v36, %v1128_v32 }
 0x334   : > { %v1016_v35 = vpop.permute.xlu0 %1015  ;;  %v1185_v19 = vsel %vm1158_vm5, %v1136_v34, %v1184_v40 }
 0x335   : > { %v1140_v42 = vrot.slane %v1016_v35, %v2938_v17 }
 0x337   : > { %v1186_v50 = vsel %vm1160_vm6, %v1140_v42, %v1185_v19 }
 0x338   : > { %v1022_v55 = vpop.permute.xlu0 %1021  ;;  %v1187_v24 = vsel %vm1162_vm7, %v1144_v38, %v1186_v50 }
 0x339   : > { %v1148_v56 = vrot.slane %v1022_v55, %v2938_v17 }
 0x33a   : > { %v1750_v44 = vpop.permute.xlu1 %1749 }
 0x33b   : > { %v1188_v61 = vsel %vm1164_vm8, %v1148_v56, %v1187_v24  ;;  %v1847_v9 = vrot.slane %v1750_v44, %v2938_v17 }
 0x33c   : > { %v1028_v15 = vpop.permute.xlu0 %1027  ;;  %v1189_v23 = vsel %vm1166_vm9, %v1152_v51, %v1188_v61 }
 0x33d   : > { %v1156_v1 = vrot.slane %v1028_v15, %v2938_v17 }
 0x33e   : > { %v1774_v52 = vpop.permute.xlu1 %1773 }
 0x33f   : > { %v1190_v58 = vsel %vm1168_vm10, %v1156_v1, %v1189_v23  ;;  %v1879_v33 = vrot.slane %v1774_v52, %v2938_v17 }
 0x340   : > { %v1753_v41 = vpop.permute.xlu0 %1752  ;;  %v1205_v60 = vsel %vm1195_vm11, %v1190_v58, 0.0 }
 0x341   : > { %1206 = vadd.xlane.f32.xlu0 %v1205_v60  ;;  %v1851_v13 = vrot.slane %v1753_v41, %v2938_v17 }
 0x342   : > { %v1798_v62 = vpop.permute.xlu1 %1797 }
 0x343   : > { %v1911_v5 = vrot.slane %v1798_v62, %v2938_v17  ;;  %v1972_v22 = vsel %vm591_vm3, %v1851_v13, %v1847_v9 }
 0x344   : > { %v1777_v47 = vpop.permute.xlu0 %1776 }
 0x345   : > { %v1883_v7 = vrot.slane %v1777_v47, %v2938_v17 }
 0x346   : > { %v1822_v53 = vpop.permute.xlu1 %1821 }
 0x347   : > { %v1943_v18 = vrot.slane %v1822_v53, %v2938_v17  ;;  %v1979_v32 = vsel %vm591_vm3, %v1883_v7, %v1879_v33 }
 0x348   : > { %v1801_v54 = vpop.permute.xlu0 %1800 }
 0x349   : > { %v1915_v45 = vrot.slane %v1801_v54, %v2938_v17 }
 0x34a   : > { %v1756_v57 = vpop.permute.xlu1 %1755 }
 0x34b   : > { %v1855_v49 = vrot.slane %v1756_v57, %v2938_v17  ;;  %v1986_v34 = vsel %vm591_vm3, %v1915_v45, %v1911_v5 }
 0x34c   : > { %v1825_v0 = vpop.permute.xlu0 %1824 }
 0x34d   : > { %v1947_v27 = vrot.slane %v1825_v0, %v2938_v17  ;;  %v1973_v35 = vsel %vm1158_vm5, %v1855_v49, %v1972_v22 }
 0x34e   : > { %v1804_v28 = vpop.permute.xlu1 %1803 }
 0x34f   : > { %v1919_v39 = vrot.slane %v1804_v28, %v2938_v17  ;;  %v1993_v42 = vsel %vm591_vm3, %v1947_v27, %v1943_v18 }
 0x350   : > { %v1780_v2 = vpop.permute.xlu0 %1779 }
 0x351   : > { %v1887_v30 = vrot.slane %v1780_v2, %v2938_v17  ;;  %v1987_v50 = vsel %vm1158_vm5, %v1919_v39, %v1986_v34 }
 0x352   : > { %v1759_v4 = vpop.permute.xlu1 %1758 }
 0x353   : > { %v1859_v29 = vrot.slane %v1759_v4, %v2938_v17  ;;  %v1980_v38 = vsel %vm1158_vm5, %v1887_v30, %v1979_v32 }
 0x354   : > { %v1828_v59 = vpop.permute.xlu0 %1827 }
 0x355   : > { %v1951_v21 = vrot.slane %v1828_v59, %v2938_v17  ;;  %v1974_v24 = vsel %vm1160_vm6, %v1859_v29, %v1973_v35 }
 0x356   : > { %v1807_v43 = vpop.permute.xlu1 %1806 }
 0x357   : > { %v1923_v36 = vrot.slane %v1807_v43, %v2938_v17  ;;  %v1994_v61 = vsel %vm1158_vm5, %v1951_v21, %v1993_v42 }
 0x358   : > { %v1783_v63 = vpop.permute.xlu0 %1782 }
 0x359   : > { %v1891_v14 = vrot.slane %v1783_v63, %v2938_v17  ;;  %v1988_v1 = vsel %vm1160_vm6, %v1923_v36, %v1987_v50 }
 0x35a   : > { %v1762_v31 = vpop.permute.xlu1 %1761 }
 0x35b   : > { %v1863_v16 = vrot.slane %v1762_v31, %v2938_v17  ;;  %v1981_v51 = vsel %vm1160_vm6, %v1891_v14, %v1980_v38 }
 0x35c   : > { %v3242_v3 = vpop.permute.xlu0 %1830 }
 0x35d   : > { %v1975_v44 = vsel %vm1162_vm7, %v1863_v16, %v1974_v24  ;;  %v1955_v60 = vrot.slane %v3242_v3, %v2938_v17 }
 0x35e   : > { %v1810_v6 = vpop.permute.xlu1 %1809 }
 0x35f   : > { %v1927_v23 = vrot.slane %v1810_v6, %v2938_v17 }
 0x360   : > { %v1786_v8 = vpop.permute.xlu0 %1785 }
 0x361   : > { %v1895_v55 = vrot.slane %v1786_v8, %v2938_v17  ;;  %v1989_v43 = vsel %vm1162_vm7, %v1927_v23, %v1988_v1 }
 0x362   : > { %v1765_v37 = vpop.permute.xlu1 %1764 }
 0x363   : > { %v1867_v19 = vrot.slane %v1765_v37, %v2938_v17  ;;  %v1982_v54 = vsel %vm1162_vm7, %v1895_v55, %v1981_v51 }
 0x364   : > { %v3244_v25 = vpop.permute.xlu0 %1833 }
 0x365   : > { %v1976_v52 = vsel %vm1164_vm8, %v1867_v19, %v1975_v44  ;;  %v1959_v53 = vrot.slane %v3244_v25, %v2938_v17  ;;  %v1995_v25 = vsel %vm1160_vm6, %v1955_v60, %v1994_v61 }
 0x366   : > { %v1813_v11 = vpop.permute.xlu1 %1812 }
 0x367   : > { %v1931_v47 = vrot.slane %v1813_v11, %v2938_v17 }
 0x368   : > { %v1789_v10 = vpop.permute.xlu0 %1788 }
 0x369   : > { %v1899_v15 = vrot.slane %v1789_v10, %v2938_v17  ;;  %v1990_v37 = vsel %vm1164_vm8, %v1931_v47, %v1989_v43 }
 0x36a   : > { %v1768_v20 = vpop.permute.xlu1 %1767 }
 0x36b   : > { %v1871_v48 = vrot.slane %v1768_v20, %v2938_v17  ;;  %v1983_v28 = vsel %vm1164_vm8, %v1899_v15, %v1982_v54 }
 0x36c   : > { %v3246_v26 = vpop.permute.xlu0 %1836 }
 0x36d   : > { %v1977_v57 = vsel %vm1166_vm9, %v1871_v48, %v1976_v52  ;;  %v1963_v59 = vrot.slane %v3246_v26, %v2938_v17  ;;  %v1996_v26 = vsel %vm1162_vm7, %v1959_v53, %v1995_v25 }
 0x36e   : > { %v1816_v40 = vpop.permute.xlu1 %1815 }
 0x36f   : > { %v1935_v0 = vrot.slane %v1816_v40, %v2938_v17  ;;  %v1997_v9 = vsel %vm1164_vm8, %v1963_v59, %v1996_v26 }
 0x370   : > { %v1792_v46 = vpop.permute.xlu0 %1791 }
 0x371   : > { %v1903_v58 = vrot.slane %v1792_v46, %v2938_v17  ;;  %v1991_v13 = vsel %vm1166_vm9, %v1935_v0, %v1990_v37 }
 0x372   : > { %v1771_v41 = vpop.permute.xlu1 %1770 }
 0x373   : > { %v1875_v62 = vrot.slane %v1771_v41, %v2938_v17  ;;  %v1984_v6 = vsel %vm1166_vm9, %v1903_v58, %v1983_v28 }
 0x374   : > { %v1840_v56 = vpop.permute.xlu0 %1839 }
 0x375   : > { %v1978_v4 = vsel %vm1168_vm10, %v1875_v62, %v1977_v57  ;;  %v1967_v3 = vrot.slane %v1840_v56, %v2938_v17 }
 0x376   : > { %v1819_v31 = vpop.permute.xlu1 %1818  ;;  %v2004_v8 = vsel %vm1195_vm11, %v1978_v4, 0.0 }
 0x377   : > { %v1939_v10 = vrot.slane %v1819_v31, %v2938_v17  ;;  %2005 = vadd.xlane.f32.xlu0 %v2004_v8  ;;  %v1998_v33 = vsel %vm1166_vm9, %v1967_v3, %v1997_v9 }
 0x378   : > { %v1795_v2 = vpop.permute.xlu0 %1794 }
 0x379   : > { %v1907_v63 = vrot.slane %v1795_v2, %v2938_v17  ;;  %v1992_v45 = vsel %vm1168_vm10, %v1939_v10, %v1991_v13 }
 0x37a   : > { %v2010_v27 = vsel %vm1195_vm11, %v1992_v45, 0.0  ;;  %v1219_v46 = vpop.permute.xlu1 %1218 }
 0x37b   : > { %v1985_v11 = vsel %vm1168_vm10, %v1907_v63, %v1984_v6  ;;  %2011 = vadd.xlane.f32.xlu0 %v2010_v27 }
 0x37c   : > { %v1843_v7 = vpop.permute.xlu0 %1842  ;;  %v2007_v20 = vsel %vm1195_vm11, %v1985_v11, 0.0 }
 0x37d   : > { %v1971_v49 = vrot.slane %v1843_v7, %v2938_v17  ;;  %2008 = vadd.xlane.f32.xlu1 %v2007_v20 }
 0x37e   : > { %v1223_v29 = vpop.permute.xlu1 %1222 }
 0x37f   : > { %v1999_v5 = vsel %vm1168_vm10, %v1971_v49, %v1998_v33  ;;  %v2373_v33 = vld [vmem:[%s2741_s21] sm:$0xff] }
 0x380   : > { %v2013_v39 = vsel %vm1195_vm11, %v1999_v5, 0.0  ;;  %v1215_v30 = vpop.permute.xlu0 %1214 }
 0x381   : > { %2014 = vadd.xlane.f32.xlu1 %v2013_v39  ;;  %v2374_v39 = vld [vmem:[%s2741_s21 + $0x8] sm:$0xff] }
 0x382   : > { %v2023_v21 = vpop.permute.xlu1 %2022 }
 0x384   : > { %v1227_v18 = vpop.permute.xlu0 %1226 }
 0x388   : > { %v2027_v17 = vpop.permute.xlu0 %2026 }
 0x391   : > { %2034 = vbcast.lane.b32.xlu0 %v3167_v12, 280 }
 0x392   : > { %2030 = vbcast.lane.b32.xlu1 %v3167_v12, 272 }
 0x3b4   : > { %v1198_v32 = vpop.xlane.xlu1 %1197 }
 0x3b5   : > { %v1201_v14 = vpop.xlane.xlu0 %1200  ;;  %v1232_v16 = vadd.f32 %v1215_v30, %v1198_v32 }
 0x3b6   : > { %v1233_v22 = vadd.f32 %v1219_v46, %v1201_v14  ;;  %v2375_v46 = vld [vmem:[%s2749_s29] sm:$0xff] }
 0x3b7   : > { %v2265_v40 = vmul.f32 -1.442695, %v1232_v16 }
 0x3b8   : > { %v2266_v36 = vmul.f32 -1.442695, %v1233_v22  ;;  %v2378_v22 = vld [vmem:[%s2741_s21 + $0x18] sm:$0xff] }
 0x3ba   : > { %2341 = vpow2.f32 %v2266_v36  ;;  %v1204_v34 = vpop.xlane.xlu1 %1203 }
 0x3bb   : > { %2343 = vpow2.f32 %v2265_v40  ;;  %v1234_v35 = vadd.f32 %v1223_v29, %v1204_v34  ;;  %v2376_v29 = vld [vmem:[%s2749_s29 + $0x8] sm:$0xff]  ;;  %v2379_v34 = vld [vmem:[%s2749_s29 + $0x10] sm:$0xff] }
 0x3bd   : > { %v2267_v42 = vmul.f32 -1.442695, %v1234_v35 }
 0x3bf   : > { %2345 = vpow2.f32 %v2267_v42  ;;  %v2380_v42 = vld [vmem:[%s2749_s29 + $0x18] sm:$0xff] }
 0x3c7   : > { %v2342_v19 = vpop.eup %2341 }
 0x3c8   : > { %v1249_v12 = vadd.f32 1.0, %v2342_v19  ;;  %v2344_v50 = vpop.eup %2343 }
 0x3c9   : > { %v1248_v55 = vadd.f32 1.0, %v2344_v50 }
 0x3ca   : > { %2347 = vrcp.f32 %v1249_v12  ;;  %v1207_v38 = vpop.xlane.xlu0 %1206 }
 0x3cb   : > { %v1235_v48 = vadd.f32 %v1227_v18, %v1207_v38  ;;  %2349 = vrcp.f32 %v1248_v55  ;;  %v2381_v55 = vld [vmem:[%s2741_s21 + $0x30] sm:$0xff] }
 0x3cc   : > { %v2346_v24 = vpop.eup %2345 }
 0x3cd   : > { %v2268_v56 = vmul.f32 -1.442695, %v1235_v48  ;;  %v1250_v61 = vadd.f32 1.0, %v2346_v24 }
 0x3cf   : > { %2351 = vpow2.f32 %v2268_v56  ;;  %v2382_v56 = vld [vmem:[%s2741_s21 + $0x38] sm:$0xff] }
 0x3d0   : > { %2353 = vrcp.f32 %v1250_v61  ;;  %v2383_v61 = vld [vmem:[%s2749_s29 + $0x30] sm:$0xff] }
 0x3d7   : > { %v2348_v51 = vpop.eup %2347 }
 0x3d8   : > { %2075 = vperm.xlu0 %2339, %v2348_v51   ;;  %v2350_v15 = vpop.eup %2349 }
 0x3d9   : > { %2070 = vperm.xlu1 %2340, %v2350_v15   ;;  %v2384_v15 = vld [vmem:[%s2749_s29 + $0x38] sm:$0xff] }
 0x3dc   : > { %v2352_v1 = vpop.eup %2351 }
 0x3dd   : > { %v1251_v44 = vadd.f32 1.0, %v2352_v1  ;;  %v2354_v23 = vpop.eup %2353 }
 0x3de   : > { %2080 = vperm.xlu1 %2340, %v2354_v23  }
 0x3df   : > { %2355 = vrcp.f32 %v1251_v44  ;;  %v2385_v44 = vld [vmem:[%s2741_s21 + $0x20] sm:$0xff] }
 0x3ec   : > { %v2356_v58 = vpop.eup %2355 }
 0x3ed   : > { %2085 = vperm.xlu0 %2339, %v2356_v58   ;;  %v2386_v58 = vld [vmem:[%s2741_s21 + $0x28] sm:$0xff] }
 0x400   : > { %v2006_v41 = vpop.xlane.xlu0 %2005 }
 0x401   : > { %v2040_v60 = vadd.f32 %v2023_v21, %v2006_v41  ;;  %v2377_v21 = vld [vmem:[%s2741_s21 + $0x10] sm:$0xff]  ;;  %s2141_s21 = scalar_lea.sflag [#allocation4], %s2734_s22 }
 0x403   : > { %v2271_v47 = vmul.f32 -1.442695, %v2040_v60 }
 0x404   : > { %v2012_v54 = vpop.xlane.xlu0 %2011 }
 0x405   : > { %2357 = vpow2.f32 %v2271_v47 }
 0x406   : > { %v2009_v52 = vpop.xlane.xlu1 %2008 }
 0x407   : > { %v2041_v62 = vadd.f32 %v2027_v17, %v2009_v52 }
 0x408   : > { %v2035_v57 = vpop.permute.xlu0 %2034 }
 0x409   : > { %v2272_v53 = vmul.f32 -1.442695, %v2041_v62  ;;  %v2387_v62 = vld [vmem:[%s2749_s29 + $0x20] sm:$0xff] }
 0x40a   : > { %v2015_v0 = vpop.xlane.xlu1 %2014 }
 0x40b   : > { %2359 = vpow2.f32 %v2272_v53  ;;  %v2043_v2 = vadd.f32 %v2035_v57, %v2015_v0  ;;  %v2388_v53 = vld [vmem:[%s2749_s29 + $0x28] sm:$0xff]  ;;  %s2520_s29 = smov [#allocation7]  }
 0x40c   : > { %s2449_s20 = sshll.u32 %s2520_s29, 4  ;;  %s2450_s20 = int_to_ptr.vmem [resolvable:$false] %s2449_s20 }
 0x40d   : > { %v2274_v59 = vmul.f32 -1.442695, %v2043_v2  ;;  %s2451_s18 = scalar_lea.vmem %s2450_s20, 2048  ;;  %p2452_p10 = scmp.lt.s32.totalorder %s3347_s0, %s2450_s20 }
 0x40e   : > { %v2031_v28 = vpop.permute.xlu1 %2030  ;;  %p2453_p0 = scmp.lt.s32.totalorder %s2451_s18, %s2445_s15 }
 0x40f   : > { %v2042_v4 = vadd.f32 %v2031_v28, %v2012_v54  ;;  %2361 = vpow2.f32 %v2274_v59 }
 0x410   : > { %p2454_p2 = por %p2453_p0, %p2452_p10 }
 0x411   : > { %v2273_v63 = vmul.f32 -1.442695, %v2042_v4 }
 0x412   : > { %v2358_v43 = vpop.eup %2357  ;;  %p2455_p4 = pnand %p2454_p2, %p2448_p7 }
 0x413   : > { %2363 = vpow2.f32 %v2273_v63  ;;  %v2056_v3 = vadd.f32 1.0, %v2358_v43 }
 0x415   : > { %2365 = vrcp.f32 %v2056_v3 }
 0x418   : > { %v2360_v31 = vpop.eup %2359 }
 0x419   : > { %v2057_v8 = vadd.f32 1.0, %v2360_v31 }
 0x41b   : > { %2367 = vrcp.f32 %v2057_v8 }
 0x41c   : > { %v2362_v6 = vpop.eup %2361 }
 0x41d   : > { %v2059_v25 = vadd.f32 1.0, %v2362_v6 }
 0x41f   : > { %2369 = vrcp.f32 %v2059_v25 }
 0x420   : > { %v2364_v37 = vpop.eup %2363 }
 0x421   : > { %v2058_v10 = vadd.f32 1.0, %v2364_v37 }
 0x422   : > { %v2366_v11 = vpop.eup %2365 }
 0x423   : > { %2371 = vrcp.f32 %v2058_v10  ;;  %2098 = vperm.xlu1 %2340, %v2366_v11  }
 0x428   : > { %v2368_v26 = vpop.eup %2367 }
 0x429   : > { %2103 = vperm.xlu0 %2339, %v2368_v26  }
 0x42c   : > { %v2370_v13 = vpop.eup %2369 }
 0x42d   : > { %2113 = vperm.xlu0 %2339, %v2370_v13  }
 0x430   : > { %v2372_v7 = vpop.eup %2371 }
 0x431   : > { %2108 = vperm.xlu1 %2340, %v2372_v7  }
 0x453   : > { %v2076_v9 = vpop.permute.xlu0 %2075 }
 0x454   : > { %v2071_v20 = vpop.permute.xlu1 %2070  ;;  %v2090_v14 = vmul.f32 %v2377_v21, %v2076_v9  ;;  %v2091_v32 = vmul.f32 %v2378_v22, %v2076_v9 }
 0x455   : > { %v2088_v5 = vmul.f32 %v2373_v33, %v2071_v20  ;;  %v2089_v30 = vmul.f32 %v2374_v39, %v2071_v20 }
 0x459   : > { %v2081_v45 = vpop.permute.xlu1 %2080 }
 0x45a   : > { %v2092_v23 = vmul.f32 %v2385_v44, %v2081_v45  ;;  %v2093_v41 = vmul.f32 %v2386_v58, %v2081_v45 }
 0x468   : > { %v2086_v49 = vpop.permute.xlu0 %2085 }
 0x469   : > { %v2094_v48 = vmul.f32 %v2381_v55, %v2086_v49  ;;  %v2095_v24 = vmul.f32 %v2382_v56, %v2086_v49 }
 0x49e   : > { %v2099_v27 = vpop.permute.xlu1 %2098 }
 0x49f   : > { %v2116_v18 = vmul.f32 %v2375_v46, %v2099_v27  ;;  %v2117_v17 = vmul.f32 %v2376_v29, %v2099_v27 }
 0x4a1   : > { %v2124_v16 = vadd.f32 %v2116_v18, %v2088_v5  ;;  %v2125_v40 = vadd.f32 %v2117_v17, %v2089_v30 }
 0x4a3   : > { %2132 = vst [vmem:[%s3326_s30] sm:$0xff] %v2124_v16  ;;  %2133 = vst [vmem:[%s3326_s30 + $0x8] sm:$0xff] %v2125_v40 }
 0x4a4   : > { %v2104_v36 = vpop.permute.xlu0 %2103 }
 0x4a5   : > { %v2118_v35 = vmul.f32 %v2379_v34, %v2104_v36  ;;  %v2119_v19 = vmul.f32 %v2380_v42, %v2104_v36 }
 0x4a7   : > { %v2126_v12 = vadd.f32 %v2118_v35, %v2090_v14  ;;  %v2127_v50 = vadd.f32 %v2119_v19, %v2091_v32 }
 0x4a8   : > { %v2114_v38 = vpop.permute.xlu0 %2113 }
 0x4a9   : > { %2134 = vst [vmem:[%s3326_s30 + $0x10] sm:$0xff] %v2126_v12  ;;  %2135 = vst [vmem:[%s3326_s30 + $0x18] sm:$0xff] %v2127_v50  ;;  %v2122_v51 = vmul.f32 %v2383_v61, %v2114_v38  ;;  %v2123_v1 = vmul.f32 %v2384_v15, %v2114_v38 }
 0x4ab   : > { %v2130_v52 = vadd.f32 %v2122_v51, %v2094_v48  ;;  %v2131_v47 = vadd.f32 %v2123_v1, %v2095_v24 }
 0x4ac   : > { %v2109_v60 = vpop.permute.xlu1 %2108 }
 0x4ad   : > { %v2120_v54 = vmul.f32 %v2387_v62, %v2109_v60  ;;  %v2121_v0 = vmul.f32 %v2388_v53, %v2109_v60  ;;  %2138 = vst [vmem:[%s3326_s30 + $0x30] sm:$0xff] %v2130_v52  ;;  %2139 = vst [vmem:[%s3326_s30 + $0x38] sm:$0xff] %v2131_v47 }
 0x4af   : > { %v2128_v57 = vadd.f32 %v2120_v54, %v2092_v23  ;;  %v2129_v2 = vadd.f32 %v2121_v0, %v2093_v41 }
 0x4b1   : > { %2136 = vst [vmem:[%s3326_s30 + $0x20] sm:$0xff] %v2128_v57  ;;  %2137 = vst [vmem:[%s3326_s30 + $0x28] sm:$0xff] %v2129_v2 }
 0x4b2   : > { %2458 = shalt.err (!%p2455_p4)
}
 0x4b3   : > { %s2459_s26 = scalar_lea.hbm %s3345_s17, 1024  ;;  %s2463_s11 = scalar_lea.hbm %s3404_s10, 2048 }
 0x4b4   : > { %p2460_p9 = scmp.ne.s32.totalorder %s3345_s17, %s2459_s26  ;;  %p2464_p5 = scmp.lt.s32.totalorder %s3345_s17, %s3404_s10 }
 0x4b5   : > { %p2465_p8 = scmp.lt.s32.totalorder %s2463_s11, %s2459_s26 }
 0x4b6   : > { %p2461_p11 = pnand %p2460_p9, %p3445_p1 }
 0x4b7   : > { %p2466_p6 = por %p2465_p8, %p2464_p5 }
 0x4b8   : > { %p2462_p3 = pneg %p2461_p11 }
 0x4ba   : > { %p2467_p13 = pnand %p2466_p6, %p2462_p3 }
 0x4bc   : > { %2470 = shalt.err (!%p2467_p13)
}
 0x4bd   : > { %s2521_s23 = smov 256   ;;  %s2522_s19 = smov 16  }
 0x4be   : > { %2287 = dma.vmem_to_hbm [thread:$0]  (%p3445_p1), %s3347_s0, 1024, %s3345_s17, %s2141_s21, %s2521_s23, %s2521_s23, %s2522_s19  }
 0x4bf PF: > { %s3446_s27 = sld [smem:[#allocation14_spill]]  ;;  %s2169_s15 = sand.u32 1, %s2501_s13  }
 0x4c0   : > { %p3448_p7 = scmp.ge.s32.totalorder %s2513_s16, 2  ;;  %s2170_s29 = scalar_lea.sflag [#allocation4], %s2169_s15 }
 0x4c5   : > { %p3447_p12 = scmp.ne.s32.totalorder %s3446_s27, 0 }
 0x4c7   : > { %p2297_p10 = pnand %p3448_p7, %p3447_p12 }
 0x4c9   : > { %p2298_p0 = pneg %p2297_p10 }
 0x4cb   : > { %2496 = dma.done.wait (%p2298_p0), %s2170_s29, 1024  }
 0x4cc   : > { %2498 = vsyncadd (%p2298_p0), %s2170_s29, 4294966272  ;;  %s3449_s16 = sld [smem:[#allocation12_spill]]  ;;  %s3452_s13 = smov %s2505_s14 }
 0x4cd   : > { %s3450_s20 = sld [smem:[#allocation11_spill]] }
 0x4ce   : > { %s3451_s15 = sld [smem:[#allocation13_spill]] }
 0x4d2   : > { %p26_p2 = scmp.ge.s32.totalorder %s3449_s16, 4  }
 0x4d3   : > { %s3453_s14 = smov %s3450_s20 }
 0x4d4   :  { %28 = sbr.rel (!%p26_p2) target bundleno = 9 (0x9), region = 118 }
 0x4d9   :  { %2175 = vsyncpa [#allocation3], 1 }
 0x4da   :  { %2177 = vsyncpa [#allocation3 + $0x1], 1 }
 0x4db   :  { %2178 = vsyncpa [#allocation6], 1 }
 0x4dc   :  { %2180 = vsyncpa [#allocation6 + $0x1], 1 }
 0x4dd   :  { %2181 = vsyncpa [#allocation4], 1 }
 0x4de   :  { %2183 = vsyncpa [#allocation4 + $0x1], 1 }

</bundles_post_ra>
